<compile_context>
chip_gen: v5e
topology: v5e:2x2
jax: 0.10.0
libtpu: 0.0.40
codegen_flags: <defaults>
</compile_context>

<pallas_src>
import functools

import jax
import jax.numpy as jnp
import numpy as np
from jax.experimental import pallas as pl
from jax.experimental.pallas import tpu as pltpu

# Model hyper-parameters (small, consistent with the module's forward).
INPUT_DIM = 16
HIDDEN_DIM = 32
OUTPUT_DIM = 16
NLAYERS = 2
SEQ_LEN = 8


def _rnn_kernel(x_ref, wih0_ref, whh0_ref, b0_ref, fxs_ref, fxo_ref, *refs,
                nlayers, hidden, seq_len):
    """Entire forward pass in a single invocation (no grid).

    refs layout:
      [w_cat_l, b_l   for l in 1..nlayers-1]   (stacked ih+hh upper weights)
      w_fc_T, b_fc,                            (remaining inputs)
      out_ref,                                 (output, (T, output_dim))
      htop_ref                                 (VMEM scratch, (T, H))
    """
    H = hidden
    T = seq_len
    n_upper = nlayers - 1
    upper_refs = [(refs[2 * l], refs[2 * l + 1]) for l in range(n_upper)]
    wfc_ref = refs[2 * n_upper]
    bfc_ref = refs[2 * n_upper + 1]
    out_ref = refs[2 * n_upper + 2]
    htop_ref = refs[2 * n_upper + 3]

    # Per-lane fixup constants, loaded once and hoisted out of the time loop.
    fix_scale = fxs_ref[...]   # (1,4H): 0.5 on i/f/o lanes, 1.0 on g lanes
    fix_off = fxo_ref[...]     # (1,4H): 0.5 on i/f/o lanes, 0.0 on g lanes

    # Hoisted layer-0 input projection (+ fused biases) for ALL timesteps;
    # kept as a traced value (exactly one (8,128) f32 vreg) -> no VMEM
    # round trip at the top of every recurrence step.
    xproj = (jnp.dot(x_ref[...], wih0_ref[...],
                     preferred_element_type=jnp.float32) + b0_ref[...])

    w_hh0 = whh0_ref[...]
    upper_w = [(w[...], b[...]) for (w, b) in upper_refs]

    def lstm_cell(gates_half, c_prev):
        # Weights/biases were pre-scaled by 0.5 on the i/f/o gate columns, so
        # a SINGLE tanh pass yields tanh(x/2) on those lanes; the affine
        # fixup 0.5*t + 0.5 reconstructs sigmoid(x). The g lanes keep
        # scale 1 / offset 0 so they stay plain tanh.
        t_all = jnp.tanh(gates_half)            # one EUP pass over (1, 4H)
        act = fix_scale * t_all + fix_off       # full-width VPU fixup
        i_g = act[:, 0:H]
        f_g = act[:, H:2 * H]
        g_g = act[:, 2 * H:3 * H]
        o_g = act[:, 3 * H:4 * H]
        c_new = f_g * c_prev + i_g * g_g
        h_new = o_g * jnp.tanh(c_new)
        return h_new, c_new

    # h0 = c0 = zeros, as in somernn.forward; state stays in registers.
    hs = [jnp.zeros((1, H), jnp.float32) for _ in range(nlayers)]
    cs = [jnp.zeros((1, H), jnp.float32) for _ in range(nlayers)]

    for t in range(T):  # statically unrolled; T is small and static
        # Layer 0: only the h-recurrent matmul remains on the critical path.
        gates0 = xproj[t:t + 1, :] + jnp.dot(
            hs[0], w_hh0, preferred_element_type=jnp.float32)
        hs[0], cs[0] = lstm_cell(gates0, cs[0])
        inp = hs[0]
        # Upper layers: ONE fused (1,2H)@(2H,4H) matmul per cell (ih and hh
        # weights stacked offline) instead of two dots plus a VPU add.
        for l in range(1, nlayers):
            w_cat, b_l = upper_w[l - 1]
            lhs = jnp.concatenate([inp, hs[l]], axis=1)   # (1, in_l + H)
            gl = jnp.dot(lhs, w_cat,
                         preferred_element_type=jnp.float32) + b_l
            hs[l], cs[l] = lstm_cell(gl, cs[l])
            inp = hs[l]
        # Accumulate top-layer hidden state for the batched fc at the end.
        htop_ref[pl.ds(t, 1), :] = inp

    # TODO(synk): nn.Dropout(0.1) is stochastic in train mode; implemented
    # here as eval-mode identity (deterministic forward).

    # Batched fc + log-softmax epilogue over all timesteps: one matmul, one
    # reduction pass, one contiguous output store.
    logits = (jnp.dot(htop_ref[...], wfc_ref[...],
                      preferred_element_type=jnp.float32) + bfc_ref[...])
    m = jnp.max(logits, axis=-1, keepdims=True)
    lse = m + jnp.log(jnp.sum(jnp.exp(logits - m), axis=-1, keepdims=True))
    out_ref[...] = (logits - lse).astype(out_ref.dtype)


def somernn_forward(x, layer_params, w_fc_T, b_fc):
    """x: (T, 1, D) float32. Returns (T, 1, output_dim) float32 log-probs."""
    T, B, D = x.shape
    assert B == 1
    nlayers = len(layer_params)
    H = layer_params[0][1].shape[0]
    O = w_fc_T.shape[1]

    x2d = x.reshape(T, D)

    # Offline gate-column scaling: sigmoid(x) = 0.5*tanh(x/2) + 0.5, so the
    # i/f/o gate columns of every weight/bias are multiplied by 0.5 here and
    # the kernel needs only one tanh per cell plus an affine fixup.
    col_scale_np = np.concatenate(
        [np.full(H, 0.5), np.full(H, 0.5), np.full(H, 1.0),
         np.full(H, 0.5)]).astype(np.float32)
    fix_off_np = np.concatenate(
        [np.full(H, 0.5), np.full(H, 0.5), np.full(H, 0.0),
         np.full(H, 0.5)]).astype(np.float32)
    col_scale = jnp.asarray(col_scale_np)                       # (4H,)
    fix_scale = jnp.asarray(col_scale_np.reshape(1, 4 * H))     # (1, 4H)
    fix_off = jnp.asarray(fix_off_np.reshape(1, 4 * H))         # (1, 4H)

    w_ih0_T, w_hh0_T, b0 = layer_params[0]
    flat = [x2d,
            w_ih0_T * col_scale,
            w_hh0_T * col_scale,
            b0 * col_scale,
            fix_scale,
            fix_off]
    for (w_ih_T, w_hh_T, b) in layer_params[1:]:
        # Stack ih and hh weights along K so the kernel issues one matmul per
        # upper-layer cell with LHS = concat([inp, h]).
        w_cat = jnp.concatenate([w_ih_T, w_hh_T], axis=0) * col_scale
        flat += [w_cat, b * col_scale]
    flat += [w_fc_T, b_fc]

    kernel = functools.partial(_rnn_kernel, nlayers=nlayers, hidden=H,
                               seq_len=T)

    out2d = pl.pallas_call(
        kernel,
        out_shape=jax.ShapeDtypeStruct((T, O), jnp.float32),
        # No grid: a single invocation with every (tiny) operand resident in
        # VMEM for the whole call -- the recurrence is strictly serial and the
        # total working set is ~100 KB, so tiling/pipelining would only add
        # per-step overhead.
        in_specs=[pl.BlockSpec(memory_space=pltpu.MemorySpace.VMEM)
                  for _ in flat],
        out_specs=pl.BlockSpec(memory_space=pltpu.MemorySpace.VMEM),
        scratch_shapes=[
            pltpu.VMEM((T, H), jnp.float32),  # top-layer h_t for all t
        ],
    )(*flat)
    return out2d.reshape(T, 1, O)


def reference_forward(x, layer_params, w_fc_T, b_fc):
    """Pure-JAX reference of somernn.forward (eval-mode dropout)."""
    T = x.shape[0]
    nlayers = len(layer_params)
    H = layer_params[0][1].shape[0]
    h = [jnp.zeros((1, H), jnp.float32) for _ in range(nlayers)]
    c = [jnp.zeros((1, H), jnp.float32) for _ in range(nlayers)]
    outs = []
    for t in range(T):
        inp = x[t]  # (1, D)
        for l, (w_ih_T, w_hh_T, b) in enumerate(layer_params):
            gates = inp @ w_ih_T + h[l] @ w_hh_T + b
            i_g = jax.nn.sigmoid(gates[:, 0:H])
            f_g = jax.nn.sigmoid(gates[:, H:2 * H])
            g_g = jnp.tanh(gates[:, 2 * H:3 * H])
            o_g = jax.nn.sigmoid(gates[:, 3 * H:4 * H])
            c[l] = f_g * c[l] + i_g * g_g
            h[l] = o_g * jnp.tanh(c[l])
            inp = h[l]
        logits = inp @ w_fc_T + b_fc
        outs.append(jax.nn.log_softmax(logits, axis=-1))
    return jnp.stack(outs)  # (T, 1, O)


def init_params(key, input_dim, hidden_dim, output_dim, nlayers):
    """Deterministic parameter init (matches PyTorch LSTM/Linear shapes)."""
    k = 1.0 / np.sqrt(hidden_dim)
    layer_params = []
    for l in range(nlayers):
        in_l = input_dim if l == 0 else hidden_dim
        key, k1, k2, k3, k4 = jax.random.split(key, 5)
        w_ih = jax.random.uniform(k1, (4 * hidden_dim, in_l), jnp.float32, -k, k)
        w_hh = jax.random.uniform(k2, (4 * hidden_dim, hidden_dim), jnp.float32, -k, k)
        b_ih = jax.random.uniform(k3, (4 * hidden_dim,), jnp.float32, -k, k)
        b_hh = jax.random.uniform(k4, (4 * hidden_dim,), jnp.float32, -k, k)
        # Pre-transpose weights and fuse biases so the kernel does x @ W directly.
        layer_params.append(
            (w_ih.T, w_hh.T, (b_ih + b_hh).reshape(1, 4 * hidden_dim))
        )
    key, k5, k6 = jax.random.split(key, 3)
    kf = 1.0 / np.sqrt(hidden_dim)
    w_fc = jax.random.uniform(k5, (output_dim, hidden_dim), jnp.float32, -kf, kf)
    b_fc = jax.random.uniform(k6, (output_dim,), jnp.float32, -kf, kf)
    return layer_params, w_fc.T, b_fc.reshape(1, output_dim)


if __name__ == "__main__":
    key = jax.random.PRNGKey(0)
    key, xkey, pkey = jax.random.split(key, 3)

    # x: [seq_len, batch=1, input_dim]  (PyTorch LSTM seq-first layout)
    x = jax.random.normal(xkey, (SEQ_LEN, 1, INPUT_DIM), jnp.float32)

    layer_params, w_fc_T, b_fc = init_params(
        pkey, INPUT_DIM, HIDDEN_DIM, OUTPUT_DIM, NLAYERS
    )

    y = somernn_forward(x, layer_params, w_fc_T, b_fc)
    y = jax.block_until_ready(y)

    y_ref = reference_forward(x, layer_params, w_fc_T, b_fc)
    np.testing.assert_allclose(np.asarray(y), np.asarray(y_ref),
                               atol=2e-5, rtol=2e-5)

    print("KERNEL_OK")
</pallas_src>

<mosaic_0001>
module attributes {stable_mosaic.version = 11 : i64} {
  func.func @_rnn_kernel(%arg0: memref<8x16xf32, #tpu.memory_space<vmem>>, %arg1: memref<16x128xf32, #tpu.memory_space<vmem>>, %arg2: memref<32x128xf32, #tpu.memory_space<vmem>>, %arg3: memref<1x128xf32, #tpu.memory_space<vmem>>, %arg4: memref<1x128xf32, #tpu.memory_space<vmem>>, %arg5: memref<1x128xf32, #tpu.memory_space<vmem>>, %arg6: memref<64x128xf32, #tpu.memory_space<vmem>>, %arg7: memref<1x128xf32, #tpu.memory_space<vmem>>, %arg8: memref<32x16xf32, #tpu.memory_space<vmem>>, %arg9: memref<1x16xf32, #tpu.memory_space<vmem>>, %arg10: memref<8x16xf32, #tpu.memory_space<vmem>>, %arg11: memref<8x32xf32, #tpu.memory_space<vmem>>) attributes {dimension_semantics = [], scalar_prefetch = 0 : i64, scratch_operands = 1 : i64, tpu.core_type = #tpu.core_type<tc>} {
    %c0 = arith.constant 0 : index
    %c0_0 = arith.constant 0 : index
    %0 = vector.load %arg4[%c0, %c0_0] : memref<1x128xf32, #tpu.memory_space<vmem>>, vector<1x128xf32>
    %c0_1 = arith.constant 0 : index
    %c0_2 = arith.constant 0 : index
    %1 = vector.load %arg5[%c0_1, %c0_2] : memref<1x128xf32, #tpu.memory_space<vmem>>, vector<1x128xf32>
    %c0_3 = arith.constant 0 : index
    %c0_4 = arith.constant 0 : index
    %2 = vector.load %arg0[%c0_3, %c0_4] : memref<8x16xf32, #tpu.memory_space<vmem>>, vector<8x16xf32>
    %c0_5 = arith.constant 0 : index
    %c0_6 = arith.constant 0 : index
    %3 = vector.load %arg1[%c0_5, %c0_6] : memref<16x128xf32, #tpu.memory_space<vmem>>, vector<16x128xf32>
    %cst = arith.constant dense<0.000000e+00> : vector<8x128xf32>
    %4 = tpu.matmul %2, %3, %cst {dimension_numbers = #tpu.dot_dimension_numbers<[1], [0], [0], [1], [0, 0, 1, 1], [], []>} : vector<8x16xf32>, vector<16x128xf32>, vector<8x128xf32> -> vector<8x128xf32>
    %c0_7 = arith.constant 0 : index
    %c0_8 = arith.constant 0 : index
    %5 = vector.load %arg3[%c0_7, %c0_8] : memref<1x128xf32, #tpu.memory_space<vmem>>, vector<1x128xf32>
    %6 = vector.broadcast %5 : vector<1x128xf32> to vector<8x128xf32>
    %7 = arith.addf %4, %6 : vector<8x128xf32>
    %c0_9 = arith.constant 0 : index
    %c0_10 = arith.constant 0 : index
    %8 = vector.load %arg2[%c0_9, %c0_10] : memref<32x128xf32, #tpu.memory_space<vmem>>, vector<32x128xf32>
    %c0_11 = arith.constant 0 : index
    %c0_12 = arith.constant 0 : index
    %9 = vector.load %arg6[%c0_11, %c0_12] : memref<64x128xf32, #tpu.memory_space<vmem>>, vector<64x128xf32>
    %c0_13 = arith.constant 0 : index
    %c0_14 = arith.constant 0 : index
    %10 = vector.load %arg7[%c0_13, %c0_14] : memref<1x128xf32, #tpu.memory_space<vmem>>, vector<1x128xf32>
    %cst_15 = arith.constant 0.000000e+00 : f32
    %11 = vector.broadcast %cst_15 : f32 to vector<1x32xf32>
    %cst_16 = arith.constant 0.000000e+00 : f32
    %12 = vector.broadcast %cst_16 : f32 to vector<1x32xf32>
    %cst_17 = arith.constant 0.000000e+00 : f32
    %13 = vector.broadcast %cst_17 : f32 to vector<1x32xf32>
    %cst_18 = arith.constant 0.000000e+00 : f32
    %14 = vector.broadcast %cst_18 : f32 to vector<1x32xf32>
    %15 = vector.extract_strided_slice %7 {offsets = [0, 0], sizes = [1, 128], strides = [1, 1]} : vector<8x128xf32> to vector<1x128xf32>
    %cst_19 = arith.constant dense<0.000000e+00> : vector<1x128xf32>
    %16 = tpu.matmul %11, %8, %cst_19 {dimension_numbers = #tpu.dot_dimension_numbers<[1], [0], [0], [1], [0, 0, 1, 1], [], []>} : vector<1x32xf32>, vector<32x128xf32>, vector<1x128xf32> -> vector<1x128xf32>
    %17 = arith.addf %15, %16 : vector<1x128xf32>
    %18 = math.tanh %17 : vector<1x128xf32>
    %19 = arith.mulf %0, %18 : vector<1x128xf32>
    %20 = arith.addf %19, %1 : vector<1x128xf32>
    %21 = vector.extract_strided_slice %20 {offsets = [0, 0], sizes = [1, 32], strides = [1, 1]} : vector<1x128xf32> to vector<1x32xf32>
    %22 = vector.extract_strided_slice %20 {offsets = [0, 32], sizes = [1, 32], strides = [1, 1]} : vector<1x128xf32> to vector<1x32xf32>
    %23 = vector.extract_strided_slice %20 {offsets = [0, 64], sizes = [1, 32], strides = [1, 1]} : vector<1x128xf32> to vector<1x32xf32>
    %24 = vector.extract_strided_slice %20 {offsets = [0, 96], sizes = [1, 32], strides = [1, 1]} : vector<1x128xf32> to vector<1x32xf32>
    %25 = arith.mulf %22, %13 : vector<1x32xf32>
    %26 = arith.mulf %21, %23 : vector<1x32xf32>
    %27 = arith.addf %25, %26 : vector<1x32xf32>
    %28 = math.tanh %27 : vector<1x32xf32>
    %29 = arith.mulf %24, %28 : vector<1x32xf32>
    %30 = tpu.concatenate %29, %12 in 1 : vector<1x32xf32>, vector<1x32xf32> -> vector<1x64xf32>
    %cst_20 = arith.constant dense<0.000000e+00> : vector<1x128xf32>
    %31 = tpu.matmul %30, %9, %cst_20 {dimension_numbers = #tpu.dot_dimension_numbers<[1], [0], [0], [1], [0, 0, 1, 1], [], []>} : vector<1x64xf32>, vector<64x128xf32>, vector<1x128xf32> -> vector<1x128xf32>
    %32 = arith.addf %31, %10 : vector<1x128xf32>
    %33 = math.tanh %32 : vector<1x128xf32>
    %34 = arith.mulf %0, %33 : vector<1x128xf32>
    %35 = arith.addf %34, %1 : vector<1x128xf32>
    %36 = vector.extract_strided_slice %35 {offsets = [0, 0], sizes = [1, 32], strides = [1, 1]} : vector<1x128xf32> to vector<1x32xf32>
    %37 = vector.extract_strided_slice %35 {offsets = [0, 32], sizes = [1, 32], strides = [1, 1]} : vector<1x128xf32> to vector<1x32xf32>
    %38 = vector.extract_strided_slice %35 {offsets = [0, 64], sizes = [1, 32], strides = [1, 1]} : vector<1x128xf32> to vector<1x32xf32>
    %39 = vector.extract_strided_slice %35 {offsets = [0, 96], sizes = [1, 32], strides = [1, 1]} : vector<1x128xf32> to vector<1x32xf32>
    %40 = arith.mulf %37, %14 : vector<1x32xf32>
    %41 = arith.mulf %36, %38 : vector<1x32xf32>
    %42 = arith.addf %40, %41 : vector<1x32xf32>
    %43 = math.tanh %42 : vector<1x32xf32>
    %44 = arith.mulf %39, %43 : vector<1x32xf32>
    %c0_21 = arith.constant 0 : index
    %c0_22 = arith.constant 0 : index
    %45 = vector.load %arg11[%c0_21, %c0_22] : memref<8x32xf32, #tpu.memory_space<vmem>>, vector<1x32xf32>
    tpu.vector_store %arg11[%c0_21, %c0_22], %44 {strides = array<i32>} : memref<8x32xf32, #tpu.memory_space<vmem>>, vector<1x32xf32>,
    %46 = vector.extract_strided_slice %7 {offsets = [1, 0], sizes = [1, 128], strides = [1, 1]} : vector<8x128xf32> to vector<1x128xf32>
    %cst_23 = arith.constant dense<0.000000e+00> : vector<1x128xf32>
    %47 = tpu.matmul %29, %8, %cst_23 {dimension_numbers = #tpu.dot_dimension_numbers<[1], [0], [0], [1], [0, 0, 1, 1], [], []>} : vector<1x32xf32>, vector<32x128xf32>, vector<1x128xf32> -> vector<1x128xf32>
    %48 = arith.addf %46, %47 : vector<1x128xf32>
    %49 = math.tanh %48 : vector<1x128xf32>
    %50 = arith.mulf %0, %49 : vector<1x128xf32>
    %51 = arith.addf %50, %1 : vector<1x128xf32>
    %52 = vector.extract_strided_slice %51 {offsets = [0, 0], sizes = [1, 32], strides = [1, 1]} : vector<1x128xf32> to vector<1x32xf32>
    %53 = vector.extract_strided_slice %51 {offsets = [0, 32], sizes = [1, 32], strides = [1, 1]} : vector<1x128xf32> to vector<1x32xf32>
    %54 = vector.extract_strided_slice %51 {offsets = [0, 64], sizes = [1, 32], strides = [1, 1]} : vector<1x128xf32> to vector<1x32xf32>
    %55 = vector.extract_strided_slice %51 {offsets = [0, 96], sizes = [1, 32], strides = [1, 1]} : vector<1x128xf32> to vector<1x32xf32>
    %56 = arith.mulf %53, %27 : vector<1x32xf32>
    %57 = arith.mulf %52, %54 : vector<1x32xf32>
    %58 = arith.addf %56, %57 : vector<1x32xf32>
    %59 = math.tanh %58 : vector<1x32xf32>
    %60 = arith.mulf %55, %59 : vector<1x32xf32>
    %61 = tpu.concatenate %60, %44 in 1 : vector<1x32xf32>, vector<1x32xf32> -> vector<1x64xf32>
    %cst_24 = arith.constant dense<0.000000e+00> : vector<1x128xf32>
    %62 = tpu.matmul %61, %9, %cst_24 {dimension_numbers = #tpu.dot_dimension_numbers<[1], [0], [0], [1], [0, 0, 1, 1], [], []>} : vector<1x64xf32>, vector<64x128xf32>, vector<1x128xf32> -> vector<1x128xf32>
    %63 = arith.addf %62, %10 : vector<1x128xf32>
    %64 = math.tanh %63 : vector<1x128xf32>
    %65 = arith.mulf %0, %64 : vector<1x128xf32>
    %66 = arith.addf %65, %1 : vector<1x128xf32>
    %67 = vector.extract_strided_slice %66 {offsets = [0, 0], sizes = [1, 32], strides = [1, 1]} : vector<1x128xf32> to vector<1x32xf32>
    %68 = vector.extract_strided_slice %66 {offsets = [0, 32], sizes = [1, 32], strides = [1, 1]} : vector<1x128xf32> to vector<1x32xf32>
    %69 = vector.extract_strided_slice %66 {offsets = [0, 64], sizes = [1, 32], strides = [1, 1]} : vector<1x128xf32> to vector<1x32xf32>
    %70 = vector.extract_strided_slice %66 {offsets = [0, 96], sizes = [1, 32], strides = [1, 1]} : vector<1x128xf32> to vector<1x32xf32>
    %71 = arith.mulf %68, %42 : vector<1x32xf32>
    %72 = arith.mulf %67, %69 : vector<1x32xf32>
    %73 = arith.addf %71, %72 : vector<1x32xf32>
    %74 = math.tanh %73 : vector<1x32xf32>
    %75 = arith.mulf %70, %74 : vector<1x32xf32>
    %c1 = arith.constant 1 : index
    %c0_25 = arith.constant 0 : index
    %76 = vector.load %arg11[%c1, %c0_25] : memref<8x32xf32, #tpu.memory_space<vmem>>, vector<1x32xf32>
    tpu.vector_store %arg11[%c1, %c0_25], %75 {strides = array<i32>} : memref<8x32xf32, #tpu.memory_space<vmem>>, vector<1x32xf32>,
    %77 = vector.extract_strided_slice %7 {offsets = [2, 0], sizes = [1, 128], strides = [1, 1]} : vector<8x128xf32> to vector<1x128xf32>
    %cst_26 = arith.constant dense<0.000000e+00> : vector<1x128xf32>
    %78 = tpu.matmul %60, %8, %cst_26 {dimension_numbers = #tpu.dot_dimension_numbers<[1], [0], [0], [1], [0, 0, 1, 1], [], []>} : vector<1x32xf32>, vector<32x128xf32>, vector<1x128xf32> -> vector<1x128xf32>
    %79 = arith.addf %77, %78 : vector<1x128xf32>
    %80 = math.tanh %79 : vector<1x128xf32>
    %81 = arith.mulf %0, %80 : vector<1x128xf32>
    %82 = arith.addf %81, %1 : vector<1x128xf32>
    %83 = vector.extract_strided_slice %82 {offsets = [0, 0], sizes = [1, 32], strides = [1, 1]} : vector<1x128xf32> to vector<1x32xf32>
    %84 = vector.extract_strided_slice %82 {offsets = [0, 32], sizes = [1, 32], strides = [1, 1]} : vector<1x128xf32> to vector<1x32xf32>
    %85 = vector.extract_strided_slice %82 {offsets = [0, 64], sizes = [1, 32], strides = [1, 1]} : vector<1x128xf32> to vector<1x32xf32>
    %86 = vector.extract_strided_slice %82 {offsets = [0, 96], sizes = [1, 32], strides = [1, 1]} : vector<1x128xf32> to vector<1x32xf32>
    %87 = arith.mulf %84, %58 : vector<1x32xf32>
    %88 = arith.mulf %83, %85 : vector<1x32xf32>
    %89 = arith.addf %87, %88 : vector<1x32xf32>
    %90 = math.tanh %89 : vector<1x32xf32>
    %91 = arith.mulf %86, %90 : vector<1x32xf32>
    %92 = tpu.concatenate %91, %75 in 1 : vector<1x32xf32>, vector<1x32xf32> -> vector<1x64xf32>
    %cst_27 = arith.constant dense<0.000000e+00> : vector<1x128xf32>
    %93 = tpu.matmul %92, %9, %cst_27 {dimension_numbers = #tpu.dot_dimension_numbers<[1], [0], [0], [1], [0, 0, 1, 1], [], []>} : vector<1x64xf32>, vector<64x128xf32>, vector<1x128xf32> -> vector<1x128xf32>
    %94 = arith.addf %93, %10 : vector<1x128xf32>
    %95 = math.tanh %94 : vector<1x128xf32>
    %96 = arith.mulf %0, %95 : vector<1x128xf32>
    %97 = arith.addf %96, %1 : vector<1x128xf32>
    %98 = vector.extract_strided_slice %97 {offsets = [0, 0], sizes = [1, 32], strides = [1, 1]} : vector<1x128xf32> to vector<1x32xf32>
    %99 = vector.extract_strided_slice %97 {offsets = [0, 32], sizes = [1, 32], strides = [1, 1]} : vector<1x128xf32> to vector<1x32xf32>
    %100 = vector.extract_strided_slice %97 {offsets = [0, 64], sizes = [1, 32], strides = [1, 1]} : vector<1x128xf32> to vector<1x32xf32>
    %101 = vector.extract_strided_slice %97 {offsets = [0, 96], sizes = [1, 32], strides = [1, 1]} : vector<1x128xf32> to vector<1x32xf32>
    %102 = arith.mulf %99, %73 : vector<1x32xf32>
    %103 = arith.mulf %98, %100 : vector<1x32xf32>
    %104 = arith.addf %102, %103 : vector<1x32xf32>
    %105 = math.tanh %104 : vector<1x32xf32>
    %106 = arith.mulf %101, %105 : vector<1x32xf32>
    %c2 = arith.constant 2 : index
    %c0_28 = arith.constant 0 : index
    %107 = vector.load %arg11[%c2, %c0_28] : memref<8x32xf32, #tpu.memory_space<vmem>>, vector<1x32xf32>
    tpu.vector_store %arg11[%c2, %c0_28], %106 {strides = array<i32>} : memref<8x32xf32, #tpu.memory_space<vmem>>, vector<1x32xf32>,
    %108 = vector.extract_strided_slice %7 {offsets = [3, 0], sizes = [1, 128], strides = [1, 1]} : vector<8x128xf32> to vector<1x128xf32>
    %cst_29 = arith.constant dense<0.000000e+00> : vector<1x128xf32>
    %109 = tpu.matmul %91, %8, %cst_29 {dimension_numbers = #tpu.dot_dimension_numbers<[1], [0], [0], [1], [0, 0, 1, 1], [], []>} : vector<1x32xf32>, vector<32x128xf32>, vector<1x128xf32> -> vector<1x128xf32>
    %110 = arith.addf %108, %109 : vector<1x128xf32>
    %111 = math.tanh %110 : vector<1x128xf32>
    %112 = arith.mulf %0, %111 : vector<1x128xf32>
    %113 = arith.addf %112, %1 : vector<1x128xf32>
    %114 = vector.extract_strided_slice %113 {offsets = [0, 0], sizes = [1, 32], strides = [1, 1]} : vector<1x128xf32> to vector<1x32xf32>
    %115 = vector.extract_strided_slice %113 {offsets = [0, 32], sizes = [1, 32], strides = [1, 1]} : vector<1x128xf32> to vector<1x32xf32>
    %116 = vector.extract_strided_slice %113 {offsets = [0, 64], sizes = [1, 32], strides = [1, 1]} : vector<1x128xf32> to vector<1x32xf32>
    %117 = vector.extract_strided_slice %113 {offsets = [0, 96], sizes = [1, 32], strides = [1, 1]} : vector<1x128xf32> to vector<1x32xf32>
    %118 = arith.mulf %115, %89 : vector<1x32xf32>
    %119 = arith.mulf %114, %116 : vector<1x32xf32>
    %120 = arith.addf %118, %119 : vector<1x32xf32>
    %121 = math.tanh %120 : vector<1x32xf32>
    %122 = arith.mulf %117, %121 : vector<1x32xf32>
    %123 = tpu.concatenate %122, %106 in 1 : vector<1x32xf32>, vector<1x32xf32> -> vector<1x64xf32>
    %cst_30 = arith.constant dense<0.000000e+00> : vector<1x128xf32>
    %124 = tpu.matmul %123, %9, %cst_30 {dimension_numbers = #tpu.dot_dimension_numbers<[1], [0], [0], [1], [0, 0, 1, 1], [], []>} : vector<1x64xf32>, vector<64x128xf32>, vector<1x128xf32> -> vector<1x128xf32>
    %125 = arith.addf %124, %10 : vector<1x128xf32>
    %126 = math.tanh %125 : vector<1x128xf32>
    %127 = arith.mulf %0, %126 : vector<1x128xf32>
    %128 = arith.addf %127, %1 : vector<1x128xf32>
    %129 = vector.extract_strided_slice %128 {offsets = [0, 0], sizes = [1, 32], strides = [1, 1]} : vector<1x128xf32> to vector<1x32xf32>
    %130 = vector.extract_strided_slice %128 {offsets = [0, 32], sizes = [1, 32], strides = [1, 1]} : vector<1x128xf32> to vector<1x32xf32>
    %131 = vector.extract_strided_slice %128 {offsets = [0, 64], sizes = [1, 32], strides = [1, 1]} : vector<1x128xf32> to vector<1x32xf32>
    %132 = vector.extract_strided_slice %128 {offsets = [0, 96], sizes = [1, 32], strides = [1, 1]} : vector<1x128xf32> to vector<1x32xf32>
    %133 = arith.mulf %130, %104 : vector<1x32xf32>
    %134 = arith.mulf %129, %131 : vector<1x32xf32>
    %135 = arith.addf %133, %134 : vector<1x32xf32>
    %136 = math.tanh %135 : vector<1x32xf32>
    %137 = arith.mulf %132, %136 : vector<1x32xf32>
    %c3 = arith.constant 3 : index
    %c0_31 = arith.constant 0 : index
    %138 = vector.load %arg11[%c3, %c0_31] : memref<8x32xf32, #tpu.memory_space<vmem>>, vector<1x32xf32>
    tpu.vector_store %arg11[%c3, %c0_31], %137 {strides = array<i32>} : memref<8x32xf32, #tpu.memory_space<vmem>>, vector<1x32xf32>,
    %139 = vector.extract_strided_slice %7 {offsets = [4, 0], sizes = [1, 128], strides = [1, 1]} : vector<8x128xf32> to vector<1x128xf32>
    %cst_32 = arith.constant dense<0.000000e+00> : vector<1x128xf32>
    %140 = tpu.matmul %122, %8, %cst_32 {dimension_numbers = #tpu.dot_dimension_numbers<[1], [0], [0], [1], [0, 0, 1, 1], [], []>} : vector<1x32xf32>, vector<32x128xf32>, vector<1x128xf32> -> vector<1x128xf32>
    %141 = arith.addf %139, %140 : vector<1x128xf32>
    %142 = math.tanh %141 : vector<1x128xf32>
    %143 = arith.mulf %0, %142 : vector<1x128xf32>
    %144 = arith.addf %143, %1 : vector<1x128xf32>
    %145 = vector.extract_strided_slice %144 {offsets = [0, 0], sizes = [1, 32], strides = [1, 1]} : vector<1x128xf32> to vector<1x32xf32>
    %146 = vector.extract_strided_slice %144 {offsets = [0, 32], sizes = [1, 32], strides = [1, 1]} : vector<1x128xf32> to vector<1x32xf32>
    %147 = vector.extract_strided_slice %144 {offsets = [0, 64], sizes = [1, 32], strides = [1, 1]} : vector<1x128xf32> to vector<1x32xf32>
    %148 = vector.extract_strided_slice %144 {offsets = [0, 96], sizes = [1, 32], strides = [1, 1]} : vector<1x128xf32> to vector<1x32xf32>
    %149 = arith.mulf %146, %120 : vector<1x32xf32>
    %150 = arith.mulf %145, %147 : vector<1x32xf32>
    %151 = arith.addf %149, %150 : vector<1x32xf32>
    %152 = math.tanh %151 : vector<1x32xf32>
    %153 = arith.mulf %148, %152 : vector<1x32xf32>
    %154 = tpu.concatenate %153, %137 in 1 : vector<1x32xf32>, vector<1x32xf32> -> vector<1x64xf32>
    %cst_33 = arith.constant dense<0.000000e+00> : vector<1x128xf32>
    %155 = tpu.matmul %154, %9, %cst_33 {dimension_numbers = #tpu.dot_dimension_numbers<[1], [0], [0], [1], [0, 0, 1, 1], [], []>} : vector<1x64xf32>, vector<64x128xf32>, vector<1x128xf32> -> vector<1x128xf32>
    %156 = arith.addf %155, %10 : vector<1x128xf32>
    %157 = math.tanh %156 : vector<1x128xf32>
    %158 = arith.mulf %0, %157 : vector<1x128xf32>
    %159 = arith.addf %158, %1 : vector<1x128xf32>
    %160 = vector.extract_strided_slice %159 {offsets = [0, 0], sizes = [1, 32], strides = [1, 1]} : vector<1x128xf32> to vector<1x32xf32>
    %161 = vector.extract_strided_slice %159 {offsets = [0, 32], sizes = [1, 32], strides = [1, 1]} : vector<1x128xf32> to vector<1x32xf32>
    %162 = vector.extract_strided_slice %159 {offsets = [0, 64], sizes = [1, 32], strides = [1, 1]} : vector<1x128xf32> to vector<1x32xf32>
    %163 = vector.extract_strided_slice %159 {offsets = [0, 96], sizes = [1, 32], strides = [1, 1]} : vector<1x128xf32> to vector<1x32xf32>
    %164 = arith.mulf %161, %135 : vector<1x32xf32>
    %165 = arith.mulf %160, %162 : vector<1x32xf32>
    %166 = arith.addf %164, %165 : vector<1x32xf32>
    %167 = math.tanh %166 : vector<1x32xf32>
    %168 = arith.mulf %163, %167 : vector<1x32xf32>
    %c4 = arith.constant 4 : index
    %c0_34 = arith.constant 0 : index
    %169 = vector.load %arg11[%c4, %c0_34] : memref<8x32xf32, #tpu.memory_space<vmem>>, vector<1x32xf32>
    tpu.vector_store %arg11[%c4, %c0_34], %168 {strides = array<i32>} : memref<8x32xf32, #tpu.memory_space<vmem>>, vector<1x32xf32>,
    %170 = vector.extract_strided_slice %7 {offsets = [5, 0], sizes = [1, 128], strides = [1, 1]} : vector<8x128xf32> to vector<1x128xf32>
    %cst_35 = arith.constant dense<0.000000e+00> : vector<1x128xf32>
    %171 = tpu.matmul %153, %8, %cst_35 {dimension_numbers = #tpu.dot_dimension_numbers<[1], [0], [0], [1], [0, 0, 1, 1], [], []>} : vector<1x32xf32>, vector<32x128xf32>, vector<1x128xf32> -> vector<1x128xf32>
    %172 = arith.addf %170, %171 : vector<1x128xf32>
    %173 = math.tanh %172 : vector<1x128xf32>
    %174 = arith.mulf %0, %173 : vector<1x128xf32>
    %175 = arith.addf %174, %1 : vector<1x128xf32>
    %176 = vector.extract_strided_slice %175 {offsets = [0, 0], sizes = [1, 32], strides = [1, 1]} : vector<1x128xf32> to vector<1x32xf32>
    %177 = vector.extract_strided_slice %175 {offsets = [0, 32], sizes = [1, 32], strides = [1, 1]} : vector<1x128xf32> to vector<1x32xf32>
    %178 = vector.extract_strided_slice %175 {offsets = [0, 64], sizes = [1, 32], strides = [1, 1]} : vector<1x128xf32> to vector<1x32xf32>
    %179 = vector.extract_strided_slice %175 {offsets = [0, 96], sizes = [1, 32], strides = [1, 1]} : vector<1x128xf32> to vector<1x32xf32>
    %180 = arith.mulf %177, %151 : vector<1x32xf32>
    %181 = arith.mulf %176, %178 : vector<1x32xf32>
    %182 = arith.addf %180, %181 : vector<1x32xf32>
    %183 = math.tanh %182 : vector<1x32xf32>
    %184 = arith.mulf %179, %183 : vector<1x32xf32>
    %185 = tpu.concatenate %184, %168 in 1 : vector<1x32xf32>, vector<1x32xf32> -> vector<1x64xf32>
    %cst_36 = arith.constant dense<0.000000e+00> : vector<1x128xf32>
    %186 = tpu.matmul %185, %9, %cst_36 {dimension_numbers = #tpu.dot_dimension_numbers<[1], [0], [0], [1], [0, 0, 1, 1], [], []>} : vector<1x64xf32>, vector<64x128xf32>, vector<1x128xf32> -> vector<1x128xf32>
    %187 = arith.addf %186, %10 : vector<1x128xf32>
    %188 = math.tanh %187 : vector<1x128xf32>
    %189 = arith.mulf %0, %188 : vector<1x128xf32>
    %190 = arith.addf %189, %1 : vector<1x128xf32>
    %191 = vector.extract_strided_slice %190 {offsets = [0, 0], sizes = [1, 32], strides = [1, 1]} : vector<1x128xf32> to vector<1x32xf32>
    %192 = vector.extract_strided_slice %190 {offsets = [0, 32], sizes = [1, 32], strides = [1, 1]} : vector<1x128xf32> to vector<1x32xf32>
    %193 = vector.extract_strided_slice %190 {offsets = [0, 64], sizes = [1, 32], strides = [1, 1]} : vector<1x128xf32> to vector<1x32xf32>
    %194 = vector.extract_strided_slice %190 {offsets = [0, 96], sizes = [1, 32], strides = [1, 1]} : vector<1x128xf32> to vector<1x32xf32>
    %195 = arith.mulf %192, %166 : vector<1x32xf32>
    %196 = arith.mulf %191, %193 : vector<1x32xf32>
    %197 = arith.addf %195, %196 : vector<1x32xf32>
    %198 = math.tanh %197 : vector<1x32xf32>
    %199 = arith.mulf %194, %198 : vector<1x32xf32>
    %c5 = arith.constant 5 : index
    %c0_37 = arith.constant 0 : index
    %200 = vector.load %arg11[%c5, %c0_37] : memref<8x32xf32, #tpu.memory_space<vmem>>, vector<1x32xf32>
    tpu.vector_store %arg11[%c5, %c0_37], %199 {strides = array<i32>} : memref<8x32xf32, #tpu.memory_space<vmem>>, vector<1x32xf32>,
    %201 = vector.extract_strided_slice %7 {offsets = [6, 0], sizes = [1, 128], strides = [1, 1]} : vector<8x128xf32> to vector<1x128xf32>
    %cst_38 = arith.constant dense<0.000000e+00> : vector<1x128xf32>
    %202 = tpu.matmul %184, %8, %cst_38 {dimension_numbers = #tpu.dot_dimension_numbers<[1], [0], [0], [1], [0, 0, 1, 1], [], []>} : vector<1x32xf32>, vector<32x128xf32>, vector<1x128xf32> -> vector<1x128xf32>
    %203 = arith.addf %201, %202 : vector<1x128xf32>
    %204 = math.tanh %203 : vector<1x128xf32>
    %205 = arith.mulf %0, %204 : vector<1x128xf32>
    %206 = arith.addf %205, %1 : vector<1x128xf32>
    %207 = vector.extract_strided_slice %206 {offsets = [0, 0], sizes = [1, 32], strides = [1, 1]} : vector<1x128xf32> to vector<1x32xf32>
    %208 = vector.extract_strided_slice %206 {offsets = [0, 32], sizes = [1, 32], strides = [1, 1]} : vector<1x128xf32> to vector<1x32xf32>
    %209 = vector.extract_strided_slice %206 {offsets = [0, 64], sizes = [1, 32], strides = [1, 1]} : vector<1x128xf32> to vector<1x32xf32>
    %210 = vector.extract_strided_slice %206 {offsets = [0, 96], sizes = [1, 32], strides = [1, 1]} : vector<1x128xf32> to vector<1x32xf32>
    %211 = arith.mulf %208, %182 : vector<1x32xf32>
    %212 = arith.mulf %207, %209 : vector<1x32xf32>
    %213 = arith.addf %211, %212 : vector<1x32xf32>
    %214 = math.tanh %213 : vector<1x32xf32>
    %215 = arith.mulf %210, %214 : vector<1x32xf32>
    %216 = tpu.concatenate %215, %199 in 1 : vector<1x32xf32>, vector<1x32xf32> -> vector<1x64xf32>
    %cst_39 = arith.constant dense<0.000000e+00> : vector<1x128xf32>
    %217 = tpu.matmul %216, %9, %cst_39 {dimension_numbers = #tpu.dot_dimension_numbers<[1], [0], [0], [1], [0, 0, 1, 1], [], []>} : vector<1x64xf32>, vector<64x128xf32>, vector<1x128xf32> -> vector<1x128xf32>
    %218 = arith.addf %217, %10 : vector<1x128xf32>
    %219 = math.tanh %218 : vector<1x128xf32>
    %220 = arith.mulf %0, %219 : vector<1x128xf32>
    %221 = arith.addf %220, %1 : vector<1x128xf32>
    %222 = vector.extract_strided_slice %221 {offsets = [0, 0], sizes = [1, 32], strides = [1, 1]} : vector<1x128xf32> to vector<1x32xf32>
    %223 = vector.extract_strided_slice %221 {offsets = [0, 32], sizes = [1, 32], strides = [1, 1]} : vector<1x128xf32> to vector<1x32xf32>
    %224 = vector.extract_strided_slice %221 {offsets = [0, 64], sizes = [1, 32], strides = [1, 1]} : vector<1x128xf32> to vector<1x32xf32>
    %225 = vector.extract_strided_slice %221 {offsets = [0, 96], sizes = [1, 32], strides = [1, 1]} : vector<1x128xf32> to vector<1x32xf32>
    %226 = arith.mulf %223, %197 : vector<1x32xf32>
    %227 = arith.mulf %222, %224 : vector<1x32xf32>
    %228 = arith.addf %226, %227 : vector<1x32xf32>
    %229 = math.tanh %228 : vector<1x32xf32>
    %230 = arith.mulf %225, %229 : vector<1x32xf32>
    %c6 = arith.constant 6 : index
    %c0_40 = arith.constant 0 : index
    %231 = vector.load %arg11[%c6, %c0_40] : memref<8x32xf32, #tpu.memory_space<vmem>>, vector<1x32xf32>
    tpu.vector_store %arg11[%c6, %c0_40], %230 {strides = array<i32>} : memref<8x32xf32, #tpu.memory_space<vmem>>, vector<1x32xf32>,
    %232 = vector.extract_strided_slice %7 {offsets = [7, 0], sizes = [1, 128], strides = [1, 1]} : vector<8x128xf32> to vector<1x128xf32>
    %cst_41 = arith.constant dense<0.000000e+00> : vector<1x128xf32>
    %233 = tpu.matmul %215, %8, %cst_41 {dimension_numbers = #tpu.dot_dimension_numbers<[1], [0], [0], [1], [0, 0, 1, 1], [], []>} : vector<1x32xf32>, vector<32x128xf32>, vector<1x128xf32> -> vector<1x128xf32>
    %234 = arith.addf %232, %233 : vector<1x128xf32>
    %235 = math.tanh %234 : vector<1x128xf32>
    %236 = arith.mulf %0, %235 : vector<1x128xf32>
    %237 = arith.addf %236, %1 : vector<1x128xf32>
    %238 = vector.extract_strided_slice %237 {offsets = [0, 0], sizes = [1, 32], strides = [1, 1]} : vector<1x128xf32> to vector<1x32xf32>
    %239 = vector.extract_strided_slice %237 {offsets = [0, 32], sizes = [1, 32], strides = [1, 1]} : vector<1x128xf32> to vector<1x32xf32>
    %240 = vector.extract_strided_slice %237 {offsets = [0, 64], sizes = [1, 32], strides = [1, 1]} : vector<1x128xf32> to vector<1x32xf32>
    %241 = vector.extract_strided_slice %237 {offsets = [0, 96], sizes = [1, 32], strides = [1, 1]} : vector<1x128xf32> to vector<1x32xf32>
    %242 = arith.mulf %239, %213 : vector<1x32xf32>
    %243 = arith.mulf %238, %240 : vector<1x32xf32>
    %244 = arith.addf %242, %243 : vector<1x32xf32>
    %245 = math.tanh %244 : vector<1x32xf32>
    %246 = arith.mulf %241, %245 : vector<1x32xf32>
    %247 = tpu.concatenate %246, %230 in 1 : vector<1x32xf32>, vector<1x32xf32> -> vector<1x64xf32>
    %cst_42 = arith.constant dense<0.000000e+00> : vector<1x128xf32>
    %248 = tpu.matmul %247, %9, %cst_42 {dimension_numbers = #tpu.dot_dimension_numbers<[1], [0], [0], [1], [0, 0, 1, 1], [], []>} : vector<1x64xf32>, vector<64x128xf32>, vector<1x128xf32> -> vector<1x128xf32>
    %249 = arith.addf %248, %10 : vector<1x128xf32>
    %250 = math.tanh %249 : vector<1x128xf32>
    %251 = arith.mulf %0, %250 : vector<1x128xf32>
    %252 = arith.addf %251, %1 : vector<1x128xf32>
    %253 = vector.extract_strided_slice %252 {offsets = [0, 0], sizes = [1, 32], strides = [1, 1]} : vector<1x128xf32> to vector<1x32xf32>
    %254 = vector.extract_strided_slice %252 {offsets = [0, 32], sizes = [1, 32], strides = [1, 1]} : vector<1x128xf32> to vector<1x32xf32>
    %255 = vector.extract_strided_slice %252 {offsets = [0, 64], sizes = [1, 32], strides = [1, 1]} : vector<1x128xf32> to vector<1x32xf32>
    %256 = vector.extract_strided_slice %252 {offsets = [0, 96], sizes = [1, 32], strides = [1, 1]} : vector<1x128xf32> to vector<1x32xf32>
    %257 = arith.mulf %254, %228 : vector<1x32xf32>
    %258 = arith.mulf %253, %255 : vector<1x32xf32>
    %259 = arith.addf %257, %258 : vector<1x32xf32>
    %260 = math.tanh %259 : vector<1x32xf32>
    %261 = arith.mulf %256, %260 : vector<1x32xf32>
    %c7 = arith.constant 7 : index
    %c0_43 = arith.constant 0 : index
    %262 = vector.load %arg11[%c7, %c0_43] : memref<8x32xf32, #tpu.memory_space<vmem>>, vector<1x32xf32>
    tpu.vector_store %arg11[%c7, %c0_43], %261 {strides = array<i32>} : memref<8x32xf32, #tpu.memory_space<vmem>>, vector<1x32xf32>,
    %c0_44 = arith.constant 0 : index
    %c0_45 = arith.constant 0 : index
    %263 = vector.load %arg11[%c0_44, %c0_45] : memref<8x32xf32, #tpu.memory_space<vmem>>, vector<8x32xf32>
    %c0_46 = arith.constant 0 : index
    %c0_47 = arith.constant 0 : index
    %264 = vector.load %arg8[%c0_46, %c0_47] : memref<32x16xf32, #tpu.memory_space<vmem>>, vector<32x16xf32>
    %cst_48 = arith.constant dense<0.000000e+00> : vector<8x16xf32>
    %265 = tpu.matmul %263, %264, %cst_48 {dimension_numbers = #tpu.dot_dimension_numbers<[1], [0], [0], [1], [0, 0, 1, 1], [], []>} : vector<8x32xf32>, vector<32x16xf32>, vector<8x16xf32> -> vector<8x16xf32>
    %c0_49 = arith.constant 0 : index
    %c0_50 = arith.constant 0 : index
    %266 = vector.load %arg9[%c0_49, %c0_50] : memref<1x16xf32, #tpu.memory_space<vmem>>, vector<1x16xf32>
    %267 = vector.broadcast %266 : vector<1x16xf32> to vector<8x16xf32>
    %268 = arith.addf %265, %267 : vector<8x16xf32>
    %cst_51 = arith.constant dense<0xFF800000> : vector<8xf32>
    %269 = vector.multi_reduction <maximumf>, %268, %cst_51 [1] : vector<8x16xf32> to vector<8xf32>
    %270 = vector.shape_cast %269 : vector<8xf32> to vector<8x1xf32>
    %271 = vector.broadcast %270 : vector<8x1xf32> to vector<8x16xf32>
    %272 = arith.subf %268, %271 : vector<8x16xf32>
    %273 = math.exp %272 : vector<8x16xf32>
    %cst_52 = arith.constant dense<0.000000e+00> : vector<8xf32>
    %274 = vector.multi_reduction <add>, %273, %cst_52 [1] : vector<8x16xf32> to vector<8xf32>
    %275 = vector.shape_cast %274 : vector<8xf32> to vector<8x1xf32>
    %276 = math.log %275 : vector<8x1xf32>
    %277 = arith.addf %270, %276 : vector<8x1xf32>
    %278 = vector.broadcast %277 : vector<8x1xf32> to vector<8x16xf32>
    %279 = arith.subf %268, %278 : vector<8x16xf32>
    %c0_53 = arith.constant 0 : index
    %c0_54 = arith.constant 0 : index
    %280 = vector.load %arg10[%c0_53, %c0_54] : memref<8x16xf32, #tpu.memory_space<vmem>>, vector<8x16xf32>
    tpu.vector_store %arg10[%c0_53, %c0_54], %279 {strides = array<i32>} : memref<8x16xf32, #tpu.memory_space<vmem>>, vector<8x16xf32>,
    return
  }
}

</mosaic_0001>

<bundles_post_ra>
// kernel: tpu_custom_call.1
= control target key start
LH: loop header
LB: loop body
LE: loop exit
PB: predicated region body
PF: predicated region fallthrough
CT: control target
= control target key end

     0   :  { %15 = vsyncpa [#allocation4], 0  ;;  %s1660_s0 = inlined_call_operand.hbm [shape: f32[8,16], index: 0, kind: input, shape index: {}]   ;;  %s1661_s1 = inlined_call_operand.vmem [shape: f32[16,128], index: 1, kind: input, shape index: {}]   ;;  %s1662_s2 = inlined_call_operand.vmem [shape: f32[32,128], index: 2, kind: input, shape index: {}]   ;;  %s1663_s3 = inlined_call_operand.vmem [shape: f32[1,128], index: 3, kind: input, shape index: {}]   ;;  %s1664_s4 = inlined_call_operand.vmem [shape: f32[1,128], index: 4, kind: input, shape index: {}]   ;;  %s1665_s5 = inlined_call_operand.vmem [shape: f32[1,128], index: 5, kind: input, shape index: {}]   ;;  %s1666_s6 = inlined_call_operand.hbm [shape: f32[64,128], index: 6, kind: input, shape index: {}]   ;;  %s1667_s7 = inlined_call_operand.vmem [shape: f32[1,128], index: 7, kind: input, shape index: {}]   ;;  %s1668_s8 = inlined_call_operand.vmem [shape: f32[32,16], index: 8, kind: input, shape index: {}]   ;;  %s1669_s9 = inlined_call_operand.vmem [shape: f32[1,16], index: 9, kind: input, shape index: {}]   ;;  %s1670_s10 = inlined_call_operand.hbm [shape: f32[8,16], index: 10, kind: output, shape index: {}]  }
   0x1   :  { %16 = vsyncpa [#allocation7], 0 }
   0x2   :  { %17 = vsyncpa [#allocation5], 0  ;;  %s23_s15 = sshll.u32 %s1660_s0, 4  ;;  %s1214_s16 = smov [#allocation3]   ;;  %s24_s15 = int_to_ptr.hbm [resolvable:$true] %s23_s15 }
   0x3   :  { %s25_s17 = sshll.u32 %s1214_s16, 4  ;;  %s43_s20 = sshll.u32 %s1666_s6, 4  ;;  %s26_s17 = int_to_ptr.vmem [resolvable:$true] %s25_s17  ;;  %s44_s20 = int_to_ptr.hbm [resolvable:$true] %s43_s20 }
   0x4   :  { %28 = dma.hbm_to_vmem [thread:$0]  %s24_s15, 128, %s26_s17, [#allocation4]  }
   0x5   :  { %s1215_s21 = smov [#allocation6]   ;;  %s1216_s23 = smov 128  }
   0x6   :  { %s45_s22 = sshll.u32 %s1215_s21, 4  ;;  %s1217_s24 = smov 8   ;;  %s46_s22 = int_to_ptr.vmem [resolvable:$true] %s45_s22 }
   0x7   :  { %51 = dma.hbm_to_vmem [thread:$0]  %s44_s20, 1024, %s46_s22, [#allocation7], %s1216_s23, %s1216_s23, %s1217_s24  }
   0x8   :  { %1208 = dma.done.wait [#allocation4], 128  }
   0x9   :  { %1209 = vsyncadd [#allocation4], 4294967168 }
   0xa   :  { %1210 = dma.done.wait [#allocation7], 1024  }
   0xb   :  { %1211 = vsyncadd [#allocation7], 4294966272  ;;  %v1286_v0 = vld [vmem:[%s1662_s2 + $0x18] sm:$0xff]  ;;  %v70_v1 = vld [vmem:[%s1661_s1 + $0x8] sm:$0xff]  ;;  %vm75_vm0 = vcmask 130048   ;;  %v1218_v7 = vmov 0.0  }
   0xc   :  { %v1294_v2 = vld [vmem:[%s1662_s2 + $0x10] sm:$0xff]  ;;  %128 = vmatpush.msra.mxu1 %v1286_v0  ;;  %93 = vmatpush.msra.mxu0 %v70_v1  ;;  %v69_v3 = vld [vmem:[%s1661_s1] sm:$0xff]  ;;  %v1303_v5 = vld [vmem:[%s1662_s2 + $0x8] sm:$0xff]  ;;  %s1220_s19 = smov 32   ;;  %vm112_vm1 = vcmask 261120   ;;  %vm163_vm2 = vcmask 523264  }
   0xd   :  { %v68_v4 = vld [vmem:[#allocation3] sm:$0xff]  ;;  %228 = vmatpush.msra.mxu3 %v1286_v0  ;;  %v1311_v6 = vld [vmem:[%s1662_s2] sm:$0xff]  ;;  %v1352_v25 = vld [vmem:[#allocation6 + $0x30] sm:$0xff]  ;;  %vm212_vm3 = vcmask 253952   ;;  %s1030_s29 = sshll.u32 %s1670_s10, 4  ;;  %s1031_s29 = int_to_ptr.hbm [resolvable:$true] %s1030_s29 }
   0xe   :  { %129 = vmatpush.msra.mxu1 %v1294_v2  ;;  %94 = vmatpush.msra.mxu0 %v69_v3  ;;  %v1066_v8 = vld [vmem:[%s1663_s3] ss:$0 sm:$0xff]  ;;  %s1219_s3 = smov 64   ;;  %v1350_v24 = vld [vmem:[#allocation6 + $0x38] sm:$0xff]  ;;  %v1361_v27 = vld [vmem:[#allocation6 + $0x20] sm:$0xff] }
   0xf   :  { %1041 = vmatmul.msk.f32.vlgmr.msra.gmra.mxu0 %vm75_vm0, %v68_v4  ;;  %229 = vmatpush.msra.mxu3 %v1294_v2  ;;  %v1335_v13 = vld [vmem:[%s1664_s4] sm:$0x1]  ;;  %v1366_v28 = vld [vmem:[#allocation6 + $0x18] sm:$0xff]  ;;  %v1371_v29 = vld [vmem:[#allocation6 + $0x10] sm:$0xff] }
  0x10   :  { %130 = vmatpush.msra.mxu1 %v1303_v5  ;;  %v1340_v15 = vld [vmem:[%s1665_s5] sm:$0x1]  ;;  %175 = vmatpush.msra.mxu2 %v1350_v24  ;;  %v1386_v34 = vld [vmem:[#allocation6] sm:$0xff] }
  0x11   :  { %230 = vmatpush.msra.mxu3 %v1303_v5  ;;  %285 = vmatpush.msrb.mxu0 %v1350_v24  ;;  %v1356_v26 = vld [vmem:[#allocation6 + $0x28] sm:$0xff] }
  0x12   :  { %131 = vmatpush.msra.mxu1 %v1311_v6  ;;  %176 = vmatpush.msra.mxu2 %v1352_v25  ;;  %v1376_v30 = vld [vmem:[#allocation6 + $0x8] sm:$0xff] }
  0x13   :  { %132 = vmatmul.f32.vlgmr.msra.gmra.mxu1 %v1218_v7  ;;  %231 = vmatpush.msra.mxu3 %v1311_v6  ;;  %v1417_v37 = vld [vmem:[%s1667_s7] sm:$0x1] }
  0x14   :  { %337 = vmatpush.msrb.mxu1 %v1286_v0  ;;  %286 = vmatpush.msrb.mxu0 %v1352_v25 }
  0x15   :  { %394 = vmatpush.msrb.mxu3 %v1350_v24  ;;  %177 = vmatpush.msra.mxu2 %v1356_v26 }
  0x16   :  { %338 = vmatpush.msrb.mxu1 %v1294_v2  ;;  %287 = vmatpush.msrb.mxu0 %v1356_v26 }
  0x17   :  { %395 = vmatpush.msrb.mxu3 %v1352_v25  ;;  %178 = vmatpush.msra.mxu2 %v1361_v27 }
  0x18   :  { %339 = vmatpush.msrb.mxu1 %v1303_v5  ;;  %288 = vmatpush.msrb.mxu0 %v1361_v27 }
  0x19   :  { %396 = vmatpush.msrb.mxu3 %v1356_v26  ;;  %179 = vmatpush.msra.mxu2 %v1366_v28 }
  0x1a   :  { %340 = vmatpush.msrb.mxu1 %v1311_v6  ;;  %289 = vmatpush.msrb.mxu0 %v1366_v28 }
  0x1b   :  { %397 = vmatpush.msrb.mxu3 %v1361_v27  ;;  %180 = vmatpush.msra.mxu2 %v1371_v29 }
  0x1c   :  { %446 = vmatpush.msra.mxu1 %v1286_v0  ;;  %290 = vmatpush.msrb.mxu0 %v1371_v29 }
  0x1d   :  { %398 = vmatpush.msrb.mxu3 %v1366_v28  ;;  %181 = vmatpush.msra.mxu2 %v1376_v30 }
  0x1e   :  { %447 = vmatpush.msra.mxu1 %v1294_v2  ;;  %291 = vmatpush.msrb.mxu0 %v1376_v30 }
  0x1f   :  { %399 = vmatpush.msrb.mxu3 %v1371_v29  ;;  %182 = vmatpush.msra.mxu2 %v1386_v34 }
  0x20   :  { %448 = vmatpush.msra.mxu1 %v1303_v5  ;;  %292 = vmatpush.msrb.mxu0 %v1386_v34 }
  0x21   :  { %400 = vmatpush.msrb.mxu3 %v1376_v30  ;;  %503 = vmatpush.msrb.mxu2 %v1350_v24 }
  0x22   :  { %449 = vmatpush.msra.mxu1 %v1311_v6  ;;  %555 = vmatpush.msra.mxu0 %v1286_v0 }
  0x23   :  { %401 = vmatpush.msrb.mxu3 %v1386_v34  ;;  %504 = vmatpush.msrb.mxu2 %v1352_v25 }
  0x24   :  { %556 = vmatpush.msra.mxu0 %v1294_v2 }
  0x25   :  { %505 = vmatpush.msrb.mxu2 %v1356_v26 }
  0x26   :  { %557 = vmatpush.msra.mxu0 %v1303_v5 }
  0x27   :  { %506 = vmatpush.msrb.mxu2 %v1361_v27 }
  0x28   :  { %558 = vmatpush.msra.mxu0 %v1311_v6 }
  0x29   :  { %507 = vmatpush.msrb.mxu2 %v1366_v28 }
  0x2b   :  { %508 = vmatpush.msrb.mxu2 %v1371_v29 }
  0x2d   :  { %509 = vmatpush.msrb.mxu2 %v1376_v30 }
  0x2f   :  { %510 = vmatpush.msrb.mxu2 %v1386_v34 }
  0x8c   :  { %v96_v9 = vpop.f32.mrf.mxu0 }
  0x8d   :  { %v1329_v10 = vadd.f32 %v1066_v8, %v96_v9 }
  0x90   :  { %v133_v11 = vpop.f32.mrf.mxu1 }
  0x91   :  { %v136_v12 = vadd.f32 %v133_v11, %v1329_v10 }
  0x93   :  { %1068 = vtanh.f32 %v136_v12 }
  0x99   :  { %v1069_v14 = vpop.eup %1068 }
  0x9a   :  { %v138_v16 = vmul.f32 %v1069_v14, %v1335_v13 }
  0x9c   :  { %v139_v17 = vadd.f32 %v138_v16, %v1340_v15 }
  0x9e   :  { %142 = vrot.lane.b32.xlu0 %v139_v17, %s1219_s3  ;;  %v140_v20 = vmul.f32 0.0, %v139_v17 }
 0x110   :  { %v143_v18 = vpop.permute.xlu0 %142 }
 0x111   :  { %v145_v19 = vmul.f32 %v143_v18, %v139_v17 }
 0x113   :  { %147 = vrot.lane.b32.xlu0 %v145_v19, %s1220_s19 }
 0x185   :  { %v148_v21 = vpop.permute.xlu0 %147 }
 0x186   :  { %v1346_v22 = vadd.f32 %v148_v21, %v140_v20 }
 0x188   :  { %1070 = vtanh.f32 %v1346_v22 }
 0x18e   :  { %v1071_v23 = vpop.eup %1070 }
 0x18f   :  { %153 = vrot.lane.b32.xlu1 %v1071_v23, %s1219_s3 }
 0x201   :  { %v154_v31 = vpop.permute.xlu1 %153 }
 0x202   :  { %v156_v32 = vmul.f32 %v154_v31, %v139_v17 }
 0x204   :  { %v158_v33 = vperm.slane %v156_v32, 0 }
 0x206   :  { %159 = vrot.lane.b32.xlu1 %v158_v33, %s1220_s19 }
 0x278   :  { %v160_v35 = vpop.permute.xlu1 %159 }
 0x279   :  { %1043 = vmatmul.msk.f32.vlgmr.msra.gmra.mxu3 %vm112_vm1, %v160_v35  ;;  %v162_v36 = vsel %vm112_vm1, %v160_v35, 0.0 }
 0x27a   :  { %1042 = vmatmul.msk.f32.vlgmr.msra.gmra.mxu2 %vm163_vm2, %v162_v36  ;;  %664 = vmatpush.msra.mxu3 %v1286_v0 }
 0x27b   :  { %773 = vmatpush.msra.mxu2 %v1286_v0 }
 0x27c   :  { %665 = vmatpush.msra.mxu3 %v1294_v2 }
 0x27d   :  { %774 = vmatpush.msra.mxu2 %v1294_v2 }
 0x27e   :  { %666 = vmatpush.msra.mxu3 %v1303_v5 }
 0x27f   :  { %775 = vmatpush.msra.mxu2 %v1303_v5 }
 0x280   :  { %667 = vmatpush.msra.mxu3 %v1311_v6 }
 0x281   :  { %776 = vmatpush.msra.mxu2 %v1311_v6 }
 0x2fc   :  { %v233_v38 = vpop.f32.mrf.mxu3 }
 0x2fd   :  { %v237_v39 = vrot.slane %v233_v38, 7  ;;  %v184_v40 = vpop.f32.mrf.mxu2 }
 0x2fe   :  { %v185_v41 = vadd.f32 %v184_v40, %v1417_v37 }
 0x2ff   :  { %v239_v42 = vadd.f32 %v237_v39, %v1329_v10 }
 0x300   :  { %1072 = vtanh.f32 %v185_v41 }
 0x301   :  { %1074 = vtanh.f32 %v239_v42 }
 0x306   :  { %v1073_v43 = vpop.eup %1072 }
 0x307   :  { %v1075_v44 = vpop.eup %1074  ;;  %v188_v45 = vmul.f32 %v1073_v43, %v1335_v13 }
 0x308   :  { %242 = vst [vmem:[#allocation1] sm:$0xff] %v1075_v44 }
 0x309   :  { %v189_v46 = vadd.f32 %v188_v45, %v1340_v15 }
 0x30b   :  { %192 = vrot.lane.b32.xlu0 %v189_v46, %s1219_s3  ;;  %v190_v58 = vmul.f32 0.0, %v189_v46 }
 0x30f   :  { %v244_v47 = vld [vmem:[#allocation1 + $0x1] ss:$9 sm:$0xff] }
 0x310   :  { %v246_v48 = vmul.f32 %v244_v47, %v1335_v13 }
 0x312   :  { %v247_v49 = vadd.f32 %v246_v48, %v1340_v15 }
 0x314   :  { %250 = vrot.lane.b32.xlu2 %v247_v49, %s1219_s3  ;;  %v248_v54 = vmul.f32 %v247_v49, %v1346_v22 }
 0x36e   :  { %v251_v50 = vpop.permute.xlu2 %250 }
 0x36f   :  { %v253_v51 = vmul.f32 %v251_v50, %v247_v49 }
 0x371   :  { %255 = vrot.lane.b32.xlu2 %v253_v51, %s1220_s19 }
 0x37d   :  { %v193_v52 = vpop.permute.xlu0 %192 }
 0x37e   :  { %v195_v53 = vmul.f32 %v193_v52, %v189_v46 }
 0x380   :  { %197 = vrot.lane.b32.xlu1 %v195_v53, %s1220_s19 }
 0x3cb   :  { %v256_v55 = vpop.permute.xlu2 %255 }
 0x3cc   :  { %v258_v56 = vadd.f32 %v256_v55, %v248_v54 }
 0x3ce   :  { %1076 = vtanh.f32 %v258_v56 }
 0x3d4   :  { %v1077_v57 = vpop.eup %1076 }
 0x3d5   :  { %261 = vrot.lane.b32.xlu2 %v1077_v57, %s1219_s3 }
 0x3f2   :  { %v198_v59 = vpop.permute.xlu1 %197 }
 0x3f3   :  { %v200_v60 = vadd.f32 %v198_v59, %v190_v58 }
 0x3f5   :  { %1078 = vtanh.f32 %v200_v60 }
 0x3fb   :  { %v1079_v61 = vpop.eup %1078 }
 0x3fc   :  { %203 = vrot.lane.b32.xlu1 %v1079_v61, %s1219_s3 }
 0x42f   :  { %v262_v62 = vpop.permute.xlu2 %261 }
 0x430   :  { %v264_v63 = vmul.f32 %v262_v62, %v247_v49 }
 0x432   :  { %v266_v1 = vperm.slane %v264_v63, 0 }
 0x434   :  { %267 = vrot.lane.b32.xlu0 %v266_v1, %s1220_s19 }
 0x46e   :  { %v204_v3 = vpop.permute.xlu1 %203 }
 0x46f   :  { %v1433_v4 = vmul.f32 %v204_v3, %v189_v46 }
 0x471   :  { %v208_v7 = vperm.slane %v1433_v4, 0 }
 0x473   :  { %270 = vrot.lane.b32.xlu2 %v208_v7, %s1219_s3 }
 0x4a6   :  { %v268_v8 = vpop.permute.xlu0 %267 }
 0x4a7   :  { %1045 = vmatmul.msk.f32.vlgmr.msrb.gmra.mxu1 %vm112_vm1, %v268_v8 }
 0x4a8   :  { %612 = vmatpush.msrb.mxu1 %v1350_v24 }
 0x4aa   :  { %613 = vmatpush.msrb.mxu1 %v1352_v25 }
 0x4ac   :  { %614 = vmatpush.msrb.mxu1 %v1356_v26 }
 0x4ae   :  { %615 = vmatpush.msrb.mxu1 %v1361_v27 }
 0x4b0   :  { %616 = vmatpush.msrb.mxu1 %v1366_v28 }
 0x4b2   :  { %617 = vmatpush.msrb.mxu1 %v1371_v29 }
 0x4b4   :  { %618 = vmatpush.msrb.mxu1 %v1376_v30 }
 0x4b6   :  { %619 = vmatpush.msrb.mxu1 %v1386_v34 }
 0x4cd   :  { %v271_v9 = vpop.permute.xlu2 %270 }
 0x4ce   :  { %v273_v11 = vsel %vm112_vm1, %v268_v8, %v271_v9 }
 0x4cf   :  { %1044 = vmatmul.msk.f32.vlgmr.msrb.gmra.mxu0 %vm163_vm2, %v273_v11 }
 0x4d0   :  { %721 = vmatpush.msrb.mxu0 %v1350_v24 }
 0x4d2   :  { %722 = vmatpush.msrb.mxu0 %v1352_v25 }
 0x4d4   :  { %723 = vmatpush.msrb.mxu0 %v1356_v26 }
 0x4d6   :  { %724 = vmatpush.msrb.mxu0 %v1361_v27 }
 0x4d8   :  { %725 = vmatpush.msrb.mxu0 %v1366_v28 }
 0x4da   :  { %726 = vmatpush.msrb.mxu0 %v1371_v29 }
 0x4dc   :  { %727 = vmatpush.msrb.mxu0 %v1376_v30 }
 0x4de   :  { %728 = vmatpush.msrb.mxu0 %v1386_v34 }
 0x524   :  { %v342_v12 = vpop.f32.mrf.mxu1 }
 0x525   :  { %v346_v14 = vrot.slane %v342_v12, 6 }
 0x527   :  { %v348_v16 = vadd.f32 %v346_v14, %v1329_v10 }
 0x529   :  { %1080 = vtanh.f32 %v348_v16 }
 0x52f   :  { %v1081_v17 = vpop.eup %1080 }
 0x530   :  { %351 = vst [vmem:[#allocation1] sm:$0xff] %v1081_v17 }
 0x537   :  { %v353_v18 = vld [vmem:[#allocation1 + $0x2] ss:$9 sm:$0xff] }
 0x538   :  { %v355_v19 = vmul.f32 %v353_v18, %v1335_v13 }
 0x53a   :  { %v356_v20 = vadd.f32 %v355_v19, %v1340_v15 }
 0x53c   :  { %359 = vrot.lane.b32.xlu0 %v356_v20, %s1219_s3  ;;  %v357_v39 = vmul.f32 %v356_v20, %v258_v56 }
 0x54c   :  { %v294_v21 = vpop.f32.mrf.mxu0 }
 0x54d   :  { %v295_v22 = vadd.f32 %v294_v21, %v1417_v37 }
 0x54f   :  { %1082 = vtanh.f32 %v295_v22 }
 0x555   :  { %v1083_v23 = vpop.eup %1082 }
 0x556   :  { %v298_v31 = vmul.f32 %v1083_v23, %v1335_v13 }
 0x558   :  { %v299_v32 = vadd.f32 %v298_v31, %v1340_v15 }
 0x55a   :  { %302 = vrot.lane.b32.xlu1 %v299_v32, %s1219_s3  ;;  %v300_v43 = vmul.f32 %v299_v32, %v200_v60 }
 0x5ae   :  { %v360_v33 = vpop.permute.xlu0 %359 }
 0x5af   :  { %v362_v35 = vmul.f32 %v360_v33, %v356_v20 }
 0x5b1   :  { %364 = vrot.lane.b32.xlu2 %v362_v35, %s1220_s19 }
 0x5cc   :  { %v303_v36 = vpop.permute.xlu1 %302 }
 0x5cd   :  { %v305_v38 = vmul.f32 %v303_v36, %v299_v32 }
 0x5cf   :  { %307 = vrot.lane.b32.xlu0 %v305_v38, %s1220_s19 }
 0x60b   :  { %v365_v40 = vpop.permute.xlu2 %364 }
 0x60c   :  { %v367_v41 = vadd.f32 %v365_v40, %v357_v39 }
 0x60e   :  { %1084 = vtanh.f32 %v367_v41 }
 0x614   :  { %v1085_v42 = vpop.eup %1084 }
 0x615   :  { %370 = vrot.lane.b32.xlu1 %v1085_v42, %s1219_s3 }
 0x641   :  { %v308_v44 = vpop.permute.xlu0 %307 }
 0x642   :  { %v310_v45 = vadd.f32 %v308_v44, %v300_v43 }
 0x644   :  { %1086 = vtanh.f32 %v310_v45 }
 0x64a   :  { %v1087_v46 = vpop.eup %1086 }
 0x64b   :  { %313 = vrot.lane.b32.xlu2 %v1087_v46, %s1219_s3 }
 0x687   :  { %v371_v47 = vpop.permute.xlu1 %370 }
 0x688   :  { %v373_v48 = vmul.f32 %v371_v47, %v356_v20 }
 0x68a   :  { %v375_v49 = vperm.slane %v373_v48, 0 }
 0x68c   :  { %376 = vrot.lane.b32.xlu0 %v375_v49, %s1220_s19 }
 0x6a5   :  { %v314_v50 = vpop.permute.xlu2 %313 }
 0x6a6   :  { %v1471_v51 = vmul.f32 %v314_v50, %v299_v32 }
 0x6a8   :  { %v318_v52 = vperm.slane %v1471_v51, 0 }
 0x6aa   :  { %379 = vrot.lane.b32.xlu1 %v318_v52, %s1219_s3 }
 0x6fe   :  { %v377_v53 = vpop.permute.xlu0 %376 }
 0x6ff   :  { %1047 = vmatmul.msk.f32.vlgmr.msra.gmra.mxu1 %vm112_vm1, %v377_v53 }
 0x700   :  { %882 = vmatpush.msra.mxu1 %v1286_v0 }
 0x702   :  { %883 = vmatpush.msra.mxu1 %v1294_v2 }
 0x704   :  { %884 = vmatpush.msra.mxu1 %v1303_v5 }
 0x706   :  { %885 = vmatpush.msra.mxu1 %v1311_v6 }
 0x71c   :  { %v380_v54 = vpop.permute.xlu1 %379 }
 0x71d   :  { %v382_v55 = vsel %vm112_vm1, %v377_v53, %v380_v54 }
 0x71e   :  { %1046 = vmatmul.msk.f32.vlgmr.msrb.gmra.mxu3 %vm163_vm2, %v382_v55 }
 0x71f   :  { %830 = vmatpush.msrb.mxu3 %v1350_v24 }
 0x721   :  { %831 = vmatpush.msrb.mxu3 %v1352_v25 }
 0x723   :  { %832 = vmatpush.msrb.mxu3 %v1356_v26 }
 0x725   :  { %833 = vmatpush.msrb.mxu3 %v1361_v27 }
 0x727   :  { %834 = vmatpush.msrb.mxu3 %v1366_v28 }
 0x729   :  { %835 = vmatpush.msrb.mxu3 %v1371_v29 }
 0x72b   :  { %836 = vmatpush.msrb.mxu3 %v1376_v30 }
 0x72d   :  { %837 = vmatpush.msrb.mxu3 %v1386_v34 }
 0x77c   :  { %v451_v0 = vpop.f32.mrf.mxu1 }
 0x77d   :  { %v455_v2 = vrot.slane %v451_v0, 5 }
 0x77f   :  { %v457_v5 = vadd.f32 %v455_v2, %v1329_v10 }
 0x781   :  { %1088 = vtanh.f32 %v457_v5 }
 0x787   :  { %v1089_v6 = vpop.eup %1088 }
 0x788   :  { %460 = vst [vmem:[#allocation1] sm:$0xff] %v1089_v6 }
 0x78f   :  { %v462_v56 = vld [vmem:[#allocation1 + $0x3] ss:$9 sm:$0xff] }
 0x790   :  { %v464_v57 = vmul.f32 %v462_v56, %v1335_v13 }
 0x792   :  { %v465_v58 = vadd.f32 %v464_v57, %v1340_v15 }
 0x794   :  { %468 = vrot.lane.b32.xlu2 %v465_v58, %s1219_s3  ;;  %v466_v11 = vmul.f32 %v465_v58, %v367_v41 }
 0x7a1   :  { %v403_v59 = vpop.f32.mrf.mxu3 }
 0x7a2   :  { %v404_v60 = vadd.f32 %v403_v59, %v1417_v37 }
 0x7a4   :  { %1090 = vtanh.f32 %v404_v60 }
 0x7aa   :  { %v1091_v61 = vpop.eup %1090 }
 0x7ab   :  { %v407_v62 = vmul.f32 %v1091_v61, %v1335_v13 }
 0x7ad   :  { %v408_v63 = vadd.f32 %v407_v62, %v1340_v15 }
 0x7af   :  { %411 = vrot.lane.b32.xlu0 %v408_v63, %s1219_s3  ;;  %v409_v17 = vmul.f32 %v408_v63, %v310_v45 }
 0x7ee   :  { %v469_v1 = vpop.permute.xlu2 %468 }
 0x7ef   :  { %v471_v3 = vmul.f32 %v469_v1, %v465_v58 }
 0x7f1   :  { %473 = vrot.lane.b32.xlu1 %v471_v3, %s1220_s19 }
 0x821   :  { %v412_v8 = vpop.permute.xlu0 %411 }
 0x822   :  { %v414_v9 = vmul.f32 %v412_v8, %v408_v63 }
 0x824   :  { %416 = vrot.lane.b32.xlu2 %v414_v9, %s1220_s19 }
 0x863   :  { %v474_v12 = vpop.permute.xlu1 %473 }
 0x864   :  { %v476_v14 = vadd.f32 %v474_v12, %v466_v11 }
 0x866   :  { %1092 = vtanh.f32 %v476_v14 }
 0x86c   :  { %v1093_v16 = vpop.eup %1092 }
 0x86d   :  { %479 = vrot.lane.b32.xlu0 %v1093_v16, %s1219_s3 }
 0x87e   :  { %v417_v18 = vpop.permute.xlu2 %416 }
 0x87f   :  { %v419_v19 = vadd.f32 %v417_v18, %v409_v17 }
 0x881   :  { %1094 = vtanh.f32 %v419_v19 }
 0x887   :  { %v1095_v20 = vpop.eup %1094 }
 0x888   :  { %422 = vrot.lane.b32.xlu1 %v1095_v20, %s1219_s3 }
 0x8df   :  { %v480_v21 = vpop.permute.xlu0 %479 }
 0x8e0   :  { %v482_v22 = vmul.f32 %v480_v21, %v465_v58 }
 0x8e2   :  { %v484_v23 = vperm.slane %v482_v22, 0 }
 0x8e4   :  { %485 = vrot.lane.b32.xlu2 %v484_v23, %s1220_s19 }
 0x8fa   :  { %v423_v31 = vpop.permute.xlu1 %422 }
 0x8fb   :  { %v1505_v32 = vmul.f32 %v423_v31, %v408_v63 }
 0x8fd   :  { %v427_v33 = vperm.slane %v1505_v32, 0  ;;  %v981_v32 = vld [vmem:[%s1668_s8 + $0x18] sm:$0xff] }
 0x8ff   :  { %488 = vrot.lane.b32.xlu0 %v427_v33, %s1219_s3 }
 0x93e   :  { %v486_v35 = vpop.permute.xlu2 %485 }
 0x93f   :  { %1049 = vmatmul.msk.f32.vlgmr.msra.gmra.mxu0 %vm112_vm1, %v486_v35 }
 0x940   :  { %1001 = vmatpush.msra.mxu0 %v981_v32 }
 0x971   :  { %v489_v36 = vpop.permute.xlu0 %488 }
 0x972   :  { %v491_v38 = vsel %vm112_vm1, %v486_v35, %v489_v36 }
 0x973   :  { %1048 = vmatmul.msk.f32.vlgmr.msrb.gmra.mxu2 %vm163_vm2, %v491_v38 }
 0x974   :  { %939 = vmatpush.msrb.mxu2 %v1350_v24 }
 0x976   :  { %940 = vmatpush.msrb.mxu2 %v1352_v25 }
 0x978   :  { %941 = vmatpush.msrb.mxu2 %v1356_v26 }
 0x97a   :  { %942 = vmatpush.msrb.mxu2 %v1361_v27 }
 0x97c   :  { %943 = vmatpush.msrb.mxu2 %v1366_v28 }
 0x97e   :  { %944 = vmatpush.msrb.mxu2 %v1371_v29 }
 0x980   :  { %945 = vmatpush.msrb.mxu2 %v1376_v30 }
 0x982   :  { %946 = vmatpush.msrb.mxu2 %v1386_v34 }
 0x9bc   :  { %v560_v39 = vpop.f32.mrf.mxu0 }
 0x9bd   :  { %v564_v40 = vrot.slane %v560_v39, 4 }
 0x9bf   :  { %v566_v41 = vadd.f32 %v564_v40, %v1329_v10 }
 0x9c1   :  { %1096 = vtanh.f32 %v566_v41 }
 0x9c7   :  { %v1097_v24 = vpop.eup %1096 }
 0x9c8   :  { %569 = vst [vmem:[#allocation1] sm:$0xff] %v1097_v24 }
 0x9cf   :  { %v571_v25 = vld [vmem:[#allocation1 + $0x4] ss:$9 sm:$0xff] }
 0x9d0   :  { %v573_v26 = vmul.f32 %v571_v25, %v1335_v13 }
 0x9d2   :  { %v574_v27 = vadd.f32 %v573_v26, %v1340_v15 }
 0x9d4   :  { %577 = vrot.lane.b32.xlu1 %v574_v27, %s1219_s3  ;;  %v575_v47 = vmul.f32 %v574_v27, %v476_v14 }
 0x9f6   :  { %v512_v28 = vpop.f32.mrf.mxu2 }
 0x9f7   :  { %v513_v29 = vadd.f32 %v512_v28, %v1417_v37 }
 0x9f9   :  { %1098 = vtanh.f32 %v513_v29 }
 0x9ff   :  { %v1099_v30 = vpop.eup %1098 }
 0xa00   :  { %v516_v34 = vmul.f32 %v1099_v30, %v1335_v13 }
 0xa02   :  { %v517_v42 = vadd.f32 %v516_v34, %v1340_v15 }
 0xa04   :  { %520 = vrot.lane.b32.xlu2 %v517_v42, %s1219_s3  ;;  %v518_v53 = vmul.f32 %v517_v42, %v419_v19 }
 0xa46   :  { %v578_v43 = vpop.permute.xlu1 %577 }
 0xa47   :  { %v580_v44 = vmul.f32 %v578_v43, %v574_v27 }
 0xa49   :  { %582 = vrot.lane.b32.xlu0 %v580_v44, %s1220_s19 }
 0xa5e   :  { %v521_v45 = vpop.permute.xlu2 %520 }
 0xa5f   :  { %v523_v46 = vmul.f32 %v521_v45, %v517_v42 }
 0xa61   :  { %525 = vrot.lane.b32.xlu1 %v523_v46, %s1220_s19 }
 0xabb   :  { %v583_v48 = vpop.permute.xlu0 %582 }
 0xabc   :  { %v585_v49 = vadd.f32 %v583_v48, %v575_v47 }
 0xabe   :  { %1100 = vtanh.f32 %v585_v49 }
 0xac4   :  { %v1101_v50 = vpop.eup %1100 }
 0xac5   :  { %588 = vrot.lane.b32.xlu2 %v1101_v50, %s1219_s3 }
 0xad3   :  { %v526_v54 = vpop.permute.xlu1 %525 }
 0xad4   :  { %v528_v55 = vadd.f32 %v526_v54, %v518_v53 }
 0xad6   :  { %1102 = vtanh.f32 %v528_v55 }
 0xadc   :  { %v1103_v0 = vpop.eup %1102 }
 0xadd   :  { %531 = vrot.lane.b32.xlu0 %v1103_v0, %s1219_s3 }
 0xb1f   :  { %v589_v2 = vpop.permute.xlu2 %588 }
 0xb20   :  { %v591_v5 = vmul.f32 %v589_v2, %v574_v27 }
 0xb22   :  { %v593_v6 = vperm.slane %v591_v5, 0 }
 0xb24   :  { %594 = vrot.lane.b32.xlu1 %v593_v6, %s1220_s19 }
 0xb4f   :  { %v532_v56 = vpop.permute.xlu0 %531 }
 0xb50   :  { %v1535_v57 = vmul.f32 %v532_v56, %v517_v42 }
 0xb52   :  { %v536_v58 = vperm.slane %v1535_v57, 0 }
 0xb54   :  { %597 = vrot.lane.b32.xlu2 %v536_v58, %s1219_s3 }
 0xb96   :  { %v595_v59 = vpop.permute.xlu1 %594 }
 0xb97   :  { %1051 = vmatmul.msk.f32.vlgmr.msra.gmra.mxu3 %vm112_vm1, %v595_v59 }
 0xbae   :  { %v598_v60 = vpop.permute.xlu2 %597 }
 0xbaf   :  { %v600_v61 = vsel %vm112_vm1, %v595_v59, %v598_v60 }
 0xbb0   :  { %1050 = vmatmul.msk.f32.vlgmr.msrb.gmra.mxu1 %vm163_vm2, %v600_v61 }
 0xc1a   :  { %v669_v62 = vpop.f32.mrf.mxu3 }
 0xc1b   :  { %v673_v63 = vrot.slane %v669_v62, 3 }
 0xc1d   :  { %v675_v1 = vadd.f32 %v673_v63, %v1329_v10 }
 0xc1f   :  { %1104 = vtanh.f32 %v675_v1 }
 0xc25   :  { %v1105_v3 = vpop.eup %1104 }
 0xc26   :  { %678 = vst [vmem:[#allocation1] sm:$0xff] %v1105_v3 }
 0xc2d   :  { %v621_v8 = vpop.f32.mrf.mxu1  ;;  %v680_v9 = vld [vmem:[#allocation1 + $0x5] ss:$9 sm:$0xff] }
 0xc2e   :  { %v622_v11 = vadd.f32 %v621_v8, %v1417_v37  ;;  %v682_v12 = vmul.f32 %v680_v9, %v1335_v13 }
 0xc30   :  { %1106 = vtanh.f32 %v622_v11  ;;  %v683_v14 = vadd.f32 %v682_v12, %v1340_v15 }
 0xc32   :  { %686 = vrot.lane.b32.xlu0 %v683_v14, %s1219_s3  ;;  %v684_v23 = vmul.f32 %v683_v14, %v585_v49 }
 0xc36   :  { %v1107_v16 = vpop.eup %1106 }
 0xc37   :  { %v625_v17 = vmul.f32 %v1107_v16, %v1335_v13 }
 0xc39   :  { %v626_v18 = vadd.f32 %v625_v17, %v1340_v15 }
 0xc3b   :  { %629 = vrot.lane.b32.xlu1 %v626_v18, %s1219_s3  ;;  %v627_v38 = vmul.f32 %v626_v18, %v528_v55 }
 0xca4   :  { %v687_v19 = vpop.permute.xlu0 %686 }
 0xca5   :  { %v689_v20 = vmul.f32 %v687_v19, %v683_v14 }
 0xca7   :  { %691 = vrot.lane.b32.xlu2 %v689_v20, %s1220_s19 }
 0xcad   :  { %v630_v21 = vpop.permute.xlu1 %629 }
 0xcae   :  { %v632_v22 = vmul.f32 %v630_v21, %v626_v18 }
 0xcb0   :  { %634 = vrot.lane.b32.xlu0 %v632_v22, %s1220_s19 }
 0xd01   :  { %v692_v31 = vpop.permute.xlu2 %691 }
 0xd02   :  { %v694_v35 = vadd.f32 %v692_v31, %v684_v23 }
 0xd04   :  { %1108 = vtanh.f32 %v694_v35 }
 0xd0a   :  { %v1109_v36 = vpop.eup %1108 }
 0xd0b   :  { %697 = vrot.lane.b32.xlu1 %v1109_v36, %s1219_s3 }
 0xd22   :  { %v635_v39 = vpop.permute.xlu0 %634 }
 0xd23   :  { %v637_v40 = vadd.f32 %v635_v39, %v627_v38 }
 0xd25   :  { %1110 = vtanh.f32 %v637_v40 }
 0xd2b   :  { %v1111_v41 = vpop.eup %1110 }
 0xd2c   :  { %640 = vrot.lane.b32.xlu2 %v1111_v41, %s1219_s3 }
 0xd7d   :  { %v698_v24 = vpop.permute.xlu1 %697 }
 0xd7e   :  { %v700_v25 = vmul.f32 %v698_v24, %v683_v14 }
 0xd80   :  { %v702_v26 = vperm.slane %v700_v25, 0 }
 0xd82   :  { %703 = vrot.lane.b32.xlu0 %v702_v26, %s1220_s19 }
 0xd86   :  { %v641_v27 = vpop.permute.xlu2 %640 }
 0xd87   :  { %v1557_v28 = vmul.f32 %v641_v27, %v626_v18 }
 0xd89   :  { %v645_v29 = vperm.slane %v1557_v28, 0 }
 0xd8b   :  { %706 = vrot.lane.b32.xlu1 %v645_v29, %s1219_s3 }
 0xdf4   :  { %v704_v30 = vpop.permute.xlu0 %703 }
 0xdf5   :  { %1053 = vmatmul.msk.f32.vlgmr.msra.gmra.mxu2 %vm112_vm1, %v704_v30 }
 0xdfd   :  { %v707_v34 = vpop.permute.xlu1 %706 }
 0xdfe   :  { %v709_v42 = vsel %vm112_vm1, %v704_v30, %v707_v34 }
 0xdff   :  { %1052 = vmatmul.msk.f32.vlgmr.msrb.gmra.mxu0 %vm163_vm2, %v709_v42 }
 0xe78   :  { %v778_v43 = vpop.f32.mrf.mxu2 }
 0xe79   :  { %v782_v44 = vrot.slane %v778_v43, 2 }
 0xe7b   :  { %v784_v45 = vadd.f32 %v782_v44, %v1329_v10 }
 0xe7c   :  { %v730_v46 = vpop.f32.mrf.mxu0 }
 0xe7d   :  { %1112 = vtanh.f32 %v784_v45  ;;  %v731_v47 = vadd.f32 %v730_v46, %v1417_v37 }
 0xe7f   :  { %1114 = vtanh.f32 %v731_v47 }
 0xe83   :  { %v1113_v48 = vpop.eup %1112 }
 0xe84   :  { %787 = vst [vmem:[#allocation1] sm:$0xff] %v1113_v48 }
 0xe85   :  { %v1115_v49 = vpop.eup %1114 }
 0xe86   :  { %v734_v50 = vmul.f32 %v1115_v49, %v1335_v13 }
 0xe88   :  { %v735_v53 = vadd.f32 %v734_v50, %v1340_v15 }
 0xe8a   :  { %738 = vrot.lane.b32.xlu0 %v735_v53, %s1219_s3  ;;  %v736_v59 = vmul.f32 %v735_v53, %v637_v40 }
 0xe8b   :  { %v789_v54 = vld [vmem:[#allocation1 + $0x6] ss:$9 sm:$0xff] }
 0xe8c   :  { %v791_v55 = vmul.f32 %v789_v54, %v1335_v13 }
 0xe8e   :  { %v792_v0 = vadd.f32 %v791_v55, %v1340_v15 }
 0xe90   :  { %795 = vrot.lane.b32.xlu2 %v792_v0, %s1219_s3  ;;  %v793_v62 = vmul.f32 %v792_v0, %v694_v35 }
 0xeea   :  { %v796_v2 = vpop.permute.xlu2 %795 }
 0xeeb   :  { %v798_v5 = vmul.f32 %v796_v2, %v792_v0 }
 0xeed   :  { %800 = vrot.lane.b32.xlu1 %v798_v5, %s1220_s19 }
 0xefc   :  { %v739_v6 = vpop.permute.xlu0 %738 }
 0xefd   :  { %v741_v56 = vmul.f32 %v739_v6, %v735_v53 }
 0xeff   :  { %743 = vrot.lane.b32.xlu2 %v741_v56, %s1220_s19 }
 0xf59   :  { %v744_v60 = vpop.permute.xlu2 %743 }
 0xf5a   :  { %v746_v61 = vadd.f32 %v744_v60, %v736_v59 }
 0xf5c   :  { %1116 = vtanh.f32 %v746_v61 }
 0xf5f   :  { %v801_v63 = vpop.permute.xlu1 %800 }
 0xf60   :  { %v803_v1 = vadd.f32 %v801_v63, %v793_v62 }
 0xf62   :  { %v1117_v3 = vpop.eup %1116  ;;  %1118 = vtanh.f32 %v803_v1 }
 0xf63   :  { %749 = vrot.lane.b32.xlu1 %v1117_v3, %s1219_s3 }
 0xf68   :  { %v1119_v8 = vpop.eup %1118 }
 0xf69   :  { %806 = vrot.lane.b32.xlu0 %v1119_v8, %s1219_s3 }
 0xfd5   :  { %v750_v9 = vpop.permute.xlu1 %749 }
 0xfd6   :  { %v1578_v11 = vmul.f32 %v750_v9, %v735_v53 }
 0xfd8   :  { %v754_v12 = vperm.slane %v1578_v11, 0  ;;  %v979_v11 = vld [vmem:[%s1668_s8 + $0x8] sm:$0xff] }
 0xfda   :  { %815 = vrot.lane.b32.xlu0 %v754_v12, %s1219_s3 }
 0xfdb   :  { %v807_v14 = vpop.permute.xlu0 %806 }
 0xfdc   :  { %v809_v16 = vmul.f32 %v807_v14, %v792_v0 }
 0xfde   :  { %v811_v17 = vperm.slane %v809_v16, 0 }
 0xfe0   :  { %812 = vrot.lane.b32.xlu2 %v811_v17, %s1220_s19  ;;  %v1067_v17 = vld [vmem:[%s1669_s9] ss:$0 sm:$0xff] }
0x103a   :  { %v813_v18 = vpop.permute.xlu2 %812 }
0x103b   :  { %1055 = vmatmul.msk.f32.vlgmr.msra.gmra.mxu1 %vm112_vm1, %v813_v18 }
0x104c   :  { %v816_v19 = vpop.permute.xlu0 %815 }
0x104d   :  { %v818_v20 = vsel %vm112_vm1, %v813_v18, %v816_v19 }
0x104e   :  { %1054 = vmatmul.msk.f32.vlgmr.msrb.gmra.mxu3 %vm163_vm2, %v818_v20 }
0x10b8   :  { %v887_v21 = vpop.f32.mrf.mxu1 }
0x10b9   :  { %v891_v22 = vrot.slane %v887_v21, 1 }
0x10bb   :  { %v893_v23 = vadd.f32 %v891_v22, %v1329_v10 }
0x10bd   :  { %1120 = vtanh.f32 %v893_v23 }
0x10c3   :  { %v1121_v31 = vpop.eup %1120 }
0x10c4   :  { %896 = vst [vmem:[#allocation1] sm:$0xff] %v1121_v31 }
0x10cb   :  { %v898_v35 = vld [vmem:[#allocation1 + $0x7] ss:$9 sm:$0xff] }
0x10cc   :  { %v900_v36 = vmul.f32 %v898_v35, %v1335_v13 }
0x10ce   :  { %v901_v38 = vadd.f32 %v900_v36, %v1340_v15 }
0x10d0   :  { %904 = vrot.lane.b32.xlu2 %v901_v38, %s1219_s3  ;;  %v902_v34 = vmul.f32 %v901_v38, %v803_v1 }
0x10d1   :  { %v839_v39 = vpop.f32.mrf.mxu3 }
0x10d2   :  { %v840_v40 = vadd.f32 %v839_v39, %v1417_v37 }
0x10d4   :  { %1122 = vtanh.f32 %v840_v40 }
0x10da   :  { %v1123_v41 = vpop.eup %1122 }
0x10db   :  { %v843_v24 = vmul.f32 %v1123_v41, %v1335_v13 }
0x10dd   :  { %v844_v25 = vadd.f32 %v843_v24, %v1340_v15 }
0x10df   :  { %847 = vrot.lane.b32.xlu1 %v844_v25, %s1219_s3  ;;  %v845_v45 = vmul.f32 %v844_v25, %v746_v61 }
0x112a   :  { %v905_v10 = vpop.permute.xlu2 %904 }
0x112b   :  { %v907_v26 = vmul.f32 %v905_v10, %v901_v38 }
0x112d   :  { %909 = vrot.lane.b32.xlu1 %v907_v26, %s1220_s19 }
0x1151   :  { %v848_v27 = vpop.permute.xlu1 %847 }
0x1152   :  { %v850_v30 = vmul.f32 %v848_v27, %v844_v25 }
0x1154   :  { %852 = vrot.lane.b32.xlu0 %v850_v30, %s1220_s19 }
0x119f   :  { %v910_v42 = vpop.permute.xlu1 %909 }
0x11a0   :  { %v912_v43 = vadd.f32 %v910_v42, %v902_v34 }
0x11a2   :  { %1124 = vtanh.f32 %v912_v43 }
0x11a8   :  { %v1125_v44 = vpop.eup %1124 }
0x11a9   :  { %915 = vrot.lane.b32.xlu0 %v1125_v44, %s1219_s3 }
0x11c6   :  { %v853_v46 = vpop.permute.xlu0 %852 }
0x11c7   :  { %v855_v47 = vadd.f32 %v853_v46, %v845_v45 }
0x11c9   :  { %1126 = vtanh.f32 %v855_v47 }
0x11cf   :  { %v1127_v48 = vpop.eup %1126 }
0x11d0   :  { %858 = vrot.lane.b32.xlu2 %v1127_v48, %s1219_s3 }
0x121b   :  { %v916_v49 = vpop.permute.xlu0 %915 }
0x121c   :  { %v918_v50 = vmul.f32 %v916_v49, %v901_v38 }
0x121e   :  { %v920_v53 = vperm.slane %v918_v50, 0 }
0x1220   :  { %921 = vrot.lane.b32.xlu1 %v920_v53, %s1220_s19 }
0x122a   :  { %v859_v54 = vpop.permute.xlu2 %858 }
0x122b   :  { %v861_v55 = vmul.f32 %v859_v54, %v844_v25 }
0x122d   :  { %v863_v0 = vperm.slane %v861_v55, 0 }
0x122f   :  { %924 = vrot.lane.b32.xlu2 %v863_v0, %s1219_s3 }
0x1289   :  { %v925_v2 = vpop.permute.xlu2 %924 }
0x1292   :  { %v922_v5 = vpop.permute.xlu1 %921 }
0x1293   :  { %v927_v6 = vsel %vm112_vm1, %v922_v5, %v925_v2 }
0x1294   :  { %1056 = vmatmul.msk.f32.vlgmr.msrb.gmra.mxu2 %vm163_vm2, %v927_v6 }
0x1317   :  { %v948_v56 = vpop.f32.mrf.mxu2 }
0x1318   :  { %v949_v59 = vadd.f32 %v948_v56, %v1417_v37 }
0x131a   :  { %1128 = vtanh.f32 %v949_v59 }
0x1320   :  { %v1129_v60 = vpop.eup %1128 }
0x1321   :  { %v952_v61 = vmul.f32 %v1129_v60, %v1335_v13 }
0x1323   :  { %v953_v62 = vadd.f32 %v952_v61, %v1340_v15 }
0x1325   :  { %956 = vrot.lane.b32.xlu0 %v953_v62, %s1219_s3 }
0x132d   :  { %209 = vrot.lane.b32.xlu0 %v208_v7, %s1220_s19  ;;  %v954_v7 = vmul.f32 %v953_v62, %v855_v47 }
0x1335   :  { %537 = vrot.lane.b32.xlu0 %v536_v58, %s1220_s19 }
0x133d   :  { %864 = vrot.lane.b32.xlu0 %v863_v0, %s1220_s19 }
0x1397   :  { %v957_v63 = vpop.permute.xlu0 %956 }
0x1398   :  { %v959_v37 = vmul.f32 %v957_v63, %v953_v62 }
0x139a   :  { %961 = vrot.lane.b32.xlu1 %v959_v37, %s1220_s19 }
0x139f   :  { %v210_v13 = vpop.permute.xlu0 %209 }
0x13a0   :  { %213 = vst.msk [vmem:[#allocation2] sm:$0x1] %vm212_vm3, %v210_v13 }
0x13a2   :  { %319 = vrot.lane.b32.xlu1 %v318_v52, %s1220_s19 }
0x13a7   :  { %v538_v15 = vpop.permute.xlu0 %537 }
0x13a8   :  { %540 = vst.msk [vmem:[#allocation2 + $0x3] sm:$0x1] %vm212_vm3, %v538_v15 }
0x13aa   :  { %646 = vrot.lane.b32.xlu1 %v645_v29, %s1220_s19 }
0x13af   :  { %v865_v4 = vpop.permute.xlu0 %864 }
0x13b0   :  { %867 = vst.msk [vmem:[#allocation2 + $0x6] sm:$0x1] %vm212_vm3, %v865_v4 }
0x140c   :  { %v962_v57 = vpop.permute.xlu1 %961 }
0x140d   :  { %v964_v58 = vadd.f32 %v962_v57, %v954_v7 }
0x140f   :  { %1130 = vtanh.f32 %v964_v58 }
0x1414   :  { %v320_v1 = vpop.permute.xlu1 %319 }
0x1415   :  { %v1131_v3 = vpop.eup %1130  ;;  %322 = vst.msk [vmem:[#allocation2 + $0x1] sm:$0x1] %vm212_vm3, %v320_v1 }
0x1416   :  { %967 = vrot.lane.b32.xlu2 %v1131_v3, %s1219_s3 }
0x141c   :  { %v647_v51 = vpop.permute.xlu1 %646 }
0x141d   :  { %649 = vst.msk [vmem:[#allocation2 + $0x4] sm:$0x1] %vm212_vm3, %v647_v51 }
0x141e   :  { %428 = vrot.lane.b32.xlu2 %v427_v33, %s1220_s19  ;;  %v980_v33 = vld [vmem:[%s1668_s8 + $0x10] sm:$0xff] }
0x141f   :  { %1002 = vmatpush.msra.mxu0 %v980_v33 }
0x1421   :  { %1003 = vmatpush.msra.mxu0 %v979_v11 }
0x1426   :  { %755 = vrot.lane.b32.xlu2 %v754_v12, %s1220_s19  ;;  %v978_v12 = vld [vmem:[%s1668_s8] sm:$0xff]  ;;  %s1221_s8 = smov [#allocation8]  }
0x1427   :  { %1004 = vmatpush.msra.mxu0 %v978_v12  ;;  %s1028_s6 = sshll.u32 %s1221_s8, 4  ;;  %s1029_s6 = int_to_ptr.vmem [resolvable:$true] %s1028_s6 }
0x1470   :  { %v968_v52 = vpop.permute.xlu2 %967 }
0x1471   :  { %v970_v28 = vmul.f32 %v968_v52, %v953_v62 }
0x1473   :  { %v972_v29 = vperm.slane %v970_v28, 0 }
0x1475   :  { %973 = vrot.lane.b32.xlu1 %v972_v29, %s1220_s19 }
0x1478   :  { %v429_v8 = vpop.permute.xlu2 %428 }
0x1479   :  { %431 = vst.msk [vmem:[#allocation2 + $0x2] sm:$0x1] %vm212_vm3, %v429_v8 }
0x1480   :  { %v756_v9 = vpop.permute.xlu2 %755 }
0x1481   :  { %758 = vst.msk [vmem:[#allocation2 + $0x5] sm:$0x1] %vm212_vm3, %v756_v9 }
0x14e7   :  { %v974_v14 = vpop.permute.xlu1 %973 }
0x14e8   :  { %976 = vst.msk [vmem:[#allocation2 + $0x7] sm:$0x1] %vm212_vm3, %v974_v14 }
0x14ef   :  { %v977_v16 = vld [vmem:[#allocation2] sm:$0xff] }
0x14f0   :  { %1057 = vmatmul.msk.f32.vlgmr.msra.gmra.mxu0 %vm112_vm1, %v977_v16 }
0x156d   :  { %v1006_v18 = vpop.f32.mrf.mxu0 }
0x156e   :  { %v1007_v19 = vadd.f32 %v1067_v17, %v1006_v18 }
0x1570   :  { %v1009_v20 = vsel %vm75_vm0, %v1007_v19, -inf }
0x1571   :  { %1010 = vmax.xlane.f32.xlu2 %v1009_v20 }
0x15e4   :  { %v1011_v21 = vpop.xlane.xlu2 %1010 }
0x15e5   :  { %v1012_v22 = vsub.f32 %v1007_v19, %v1011_v21 }
0x15e7   :  { %v1013_v23 = vmul.f32 1.442695, %v1012_v22 }
0x15e9   :  { %1132 = vpow2.f32 %v1013_v23 }
0x15ef   :  { %v1133_v31 = vpop.eup %1132 }
0x15f0   :  { %v1015_v35 = vsel %vm75_vm0, %v1133_v31, 0.0 }
0x15f1   :  { %1016 = vadd.xlane.f32.xlu0 %v1015_v35 }
0x1664   :  { %v1017_v36 = vpop.xlane.xlu0 %1016 }
0x1665   :  { %1134 = vlog2.f32 %v1017_v36 }
0x166b   :  { %v1135_v38 = vpop.eup %1134 }
0x166c   :  { %v1019_v39 = vmul.f32 0.6931472, %v1135_v38 }
0x166e   :  { %v1020_v40 = vadd.f32 %v1019_v39, %v1011_v21 }
0x1670   :  { %v1021_v41 = vsub.f32 %v1007_v19, %v1020_v40 }
0x1672   :  { %1022 = vst.msk [vmem:[#allocation8] sm:$0xff] %vm75_vm0, %v1021_v41 }
0x1673   :  { %1033 = dma.vmem_to_hbm [thread:$0]  %s1029_s6, 128, %s1031_s29, [#allocation5]  }
0x1674   :  { %1212 = dma.done.wait [#allocation5], 128  }
0x1675   :  { %1213 = vsyncadd [#allocation5], 4294967168 }
0x1676   :  { %1038 = vsyncpa [#allocation4], 1 }
0x1677   :  { %1039 = vsyncpa [#allocation7], 1 }
0x1678   :  { %1040 = vsyncpa [#allocation5], 1 }

</bundles_post_ra>
